<compile_context>
chip_gen: v7x
topology: tpu7x:2x2x1
jax: 0.10.0
libtpu: 0.0.40
codegen_flags: <defaults>
</compile_context>

<pallas_src>
import math
import jax
import jax.numpy as jnp
from jax.experimental import pallas as pl
from jax.experimental.pallas import tpu as pltpu

# ----------------------- small config consistent with the module -------------
IMG = 16          # img_size
IN_CH = 3         # in_channels
PATCH = 8         # patch_size
EMBED = 32        # embed_dim
HIDDEN = 64       # hidden_dim
HEADS = 4         # num_heads
LAYERS = 2        # num_layers
CLASSES = 10      # num_classes
BATCH = 2

N_PATCHES = (IMG // PATCH) ** 2      # 4
SEQ = N_PATCHES + 1                  # 5 (cls token + patches)
HEAD_DIM = EMBED // HEADS            # 8
CPP = IN_CH * PATCH * PATCH          # 192 (flattened patch length)
LANE = 128                           # lane-dense padding width
EPS = 1e-6


# ----------------------------- in-kernel helpers ------------------------------
def _layernorm(x, w, b):
    mu = jnp.mean(x, axis=-1, keepdims=True)
    var = jnp.mean((x - mu) ** 2, axis=-1, keepdims=True)
    return (x - mu) * jax.lax.rsqrt(var + EPS) * w + b


def _gelu(x):
    # exact (erf based) GELU, matching torch.nn.GELU() default
    return 0.5 * x * (1.0 + jax.lax.erf(x * (1.0 / math.sqrt(2.0))))


# ------------------------------ fused ViT kernel ------------------------------
def _vit_kernel(
    patches_ref,   # (B*N_PATCHES, CPP)          flattened patches
    wpatch_ref,    # (CPP, D)                    patch-embedding weight
    clspos_ref,    # (SEQ, D)  row0 = cls+pos0, rows 1.. = pos[1:]
    wqkv_ref,      # (L, D, 3D)
    wo_ref,        # (L, D, D)
    w1_ref,        # (L, D, HIDDEN)
    w2_ref,        # (L, HIDDEN, D)
    vec_ref,       # (L, 8, 128) packed [ln1w,ln1b,ln2w,ln2b,bqkv,bo,b1,b2]
    headw_ref,     # (D, 128)   classifier weight padded to 128 lanes
    fvec_ref,      # (8, 128)   packed [ln_w, ln_b, head_b(128), b_patch]
    o_ref,         # (B, 128)   padded logits
):
    D, H, S, B, NP, HD = EMBED, HIDDEN, SEQ, BATCH, N_PATCHES, HEAD_DIM

    fvec = fvec_ref[...]
    b_patch = fvec[3:4, :D]

    # ---- patch embedding for the whole batch at once -------------------------
    emb = (
        jnp.dot(patches_ref[...], wpatch_ref[...], preferred_element_type=jnp.float32)
        + b_patch
    )                                                    # (B*N, D)

    # ---- assemble tokens (B*S, D): [cls+pos0 ; patches+pos1..] per batch -----
    clspos = clspos_ref[...]                             # (S, D)
    rows = []
    for b in range(B):
        rows.append(clspos[0:1, :])                      # cls token + pos[0]
        rows.append(emb[b * NP:(b + 1) * NP, :] + clspos[1:, :])
    x = jnp.concatenate(rows, axis=0)                    # (B*S, D)
    # dropout(p=0.0) is the identity

    scale = 1.0 / math.sqrt(HD)
    for l in range(LAYERS):                              # statically unrolled
        vec = vec_ref[l]                                 # (8, 128)
        ln1w, ln1b = vec[0:1, :D], vec[1:2, :D]
        ln2w, ln2b = vec[2:3, :D], vec[3:4, :D]
        bqkv = vec[4:5, :3 * D]
        bo = vec[5:6, :D]
        b1 = vec[6:7, :H]
        b2 = vec[7:8, :D]

        # ---- pre-LN multi-head self-attention + residual ----------------------
        xn = _layernorm(x, ln1w, ln1b)
        qkv = jnp.dot(xn, wqkv_ref[l], preferred_element_type=jnp.float32) + bqkv
        q, k, v = qkv[:, :D], qkv[:, D:2 * D], qkv[:, 2 * D:]

        att_rows = []
        for b in range(B):                               # small static loops
            r0, r1 = b * S, (b + 1) * S
            head_outs = []
            for h in range(HEADS):
                c0, c1 = h * HD, (h + 1) * HD
                qh = q[r0:r1, c0:c1]
                kh = k[r0:r1, c0:c1]
                vh = v[r0:r1, c0:c1]
                # scores = qh @ kh.T (contract head dim, no explicit transpose)
                s = jax.lax.dot_general(
                    qh, kh, (((1,), (1,)), ((), ())),
                    preferred_element_type=jnp.float32,
                ) * scale
                s = s - jnp.max(s, axis=-1, keepdims=True)
                p = jnp.exp(s)
                p = p / jnp.sum(p, axis=-1, keepdims=True)
                head_outs.append(
                    jnp.dot(p, vh, preferred_element_type=jnp.float32))
            # one lane-dense (S, D) tensor per batch element (no masked stores)
            att_rows.append(jnp.concatenate(head_outs, axis=-1))
        att = jnp.concatenate(att_rows, axis=0)          # (B*S, D)

        x = x + jnp.dot(att, wo_ref[l], preferred_element_type=jnp.float32) + bo

        # ---- LN + MLP(GELU) + residual ----------------------------------------
        xn2 = _layernorm(x, ln2w, ln2b)
        h1 = _gelu(jnp.dot(xn2, w1_ref[l], preferred_element_type=jnp.float32) + b1)
        x = x + jnp.dot(h1, w2_ref[l], preferred_element_type=jnp.float32) + b2

    # ---- final LN (per-token, so applying it to cls rows only is equivalent) --
    lnw, lnb = fvec[0:1, :D], fvec[1:2, :D]
    head_b = fvec[2:3, :]                                # (1, 128), zero-padded
    cls = jnp.concatenate([x[b * S:b * S + 1, :] for b in range(B)], axis=0)
    cls = _layernorm(cls, lnw, lnb)                      # (B, D)
    o_ref[...] = (
        jnp.dot(cls, headw_ref[...], preferred_element_type=jnp.float32) + head_b
    )


# ------------------------------- JAX glue -------------------------------------
def extract_patches(x):
    """NCHW image -> (B, N, C*P*P) flattened patches (matches Conv2d k=s=P)."""
    B, C, Hh, W = x.shape
    nh, nw = Hh // PATCH, W // PATCH
    x = x.reshape(B, C, nh, PATCH, nw, PATCH)
    x = x.transpose(0, 2, 4, 1, 3, 5)          # (B, nh, nw, C, P, P)
    return x.reshape(B, nh * nw, C * PATCH * PATCH)


def vit_forward(x, params):
    B = x.shape[0]
    patches = extract_patches(x).reshape(B * N_PATCHES, CPP)

    inputs = (
        patches,
        params["w_patch"],
        params["clspos"],
        params["wqkv"],
        params["wo"],
        params["w1"],
        params["w2"],
        params["vec"],
        params["head_w"],
        params["fvec"],
    )

    def full_spec(a):
        nd = a.ndim
        return pl.BlockSpec(a.shape, lambda i, _nd=nd: (0,) * _nd)

    logits_pad = pl.pallas_call(
        _vit_kernel,
        out_shape=jax.ShapeDtypeStruct((B, LANE), jnp.float32),
        grid=(1,),
        in_specs=[full_spec(a) for a in inputs],
        out_specs=pl.BlockSpec((B, LANE), lambda i: (0, 0)),
        compiler_params=pltpu.CompilerParams(
            dimension_semantics=("arbitrary",),
            vmem_limit_bytes=32 * 1024 * 1024,
        ),
    )(*inputs)
    return logits_pad[:, :CLASSES]


# --------------------------- parameter construction ---------------------------
def _trunc_normal(key, shape, std=0.02):
    return jax.random.truncated_normal(key, -2.0, 2.0, shape, jnp.float32) * std


def _pad_row(v, width=LANE):
    v = v.reshape(1, -1).astype(jnp.float32)
    return jnp.pad(v, ((0, 0), (0, width - v.shape[1])))


def init_params(key):
    keys = iter(jax.random.split(key, 4 + 4 * LAYERS))
    p = {}

    # patch embedding (Conv2d k=s=P) -> flattened weight (C*P*P, D)
    w_conv = _trunc_normal(next(keys), (EMBED, IN_CH, PATCH, PATCH))
    p["w_patch"] = w_conv.reshape(EMBED, CPP).T
    b_patch = jnp.zeros((EMBED,), jnp.float32)

    cls_token = jax.random.normal(next(keys), (EMBED,), jnp.float32)
    pos = jax.random.normal(next(keys), (SEQ, EMBED), jnp.float32)
    # row0 = cls + pos[0]; rows 1.. = pos[1:]  (pure parameter re-packing)
    p["clspos"] = jnp.concatenate(
        [(cls_token + pos[0]).reshape(1, EMBED), pos[1:]], axis=0)

    wqkv, wo, w1, w2, vec = [], [], [], [], []
    for _ in range(LAYERS):
        wqkv.append(_trunc_normal(next(keys), (EMBED, 3 * EMBED)))
        wo.append(_trunc_normal(next(keys), (EMBED, EMBED)))
        w1.append(_trunc_normal(next(keys), (EMBED, HIDDEN)))
        w2.append(_trunc_normal(next(keys), (HIDDEN, EMBED)))
        ln1w = jnp.ones((EMBED,), jnp.float32)
        ln1b = jnp.zeros((EMBED,), jnp.float32)
        ln2w = jnp.ones((EMBED,), jnp.float32)
        ln2b = jnp.zeros((EMBED,), jnp.float32)
        bqkv = jnp.zeros((3 * EMBED,), jnp.float32)
        bo = jnp.zeros((EMBED,), jnp.float32)
        b1 = jnp.zeros((HIDDEN,), jnp.float32)
        b2 = jnp.zeros((EMBED,), jnp.float32)
        vec.append(jnp.concatenate(
            [_pad_row(v) for v in (ln1w, ln1b, ln2w, ln2b, bqkv, bo, b1, b2)],
            axis=0))                                     # (8, 128)

    p["wqkv"] = jnp.stack(wqkv)     # (L, D, 3D)
    p["wo"] = jnp.stack(wo)         # (L, D, D)
    p["w1"] = jnp.stack(w1)         # (L, D, HIDDEN)
    p["w2"] = jnp.stack(w2)         # (L, HIDDEN, D)
    p["vec"] = jnp.stack(vec)       # (L, 8, 128)

    head_w = _trunc_normal(next(keys), (EMBED, CLASSES))
    p["head_w"] = jnp.pad(head_w, ((0, 0), (0, LANE - CLASSES)))   # (D, 128)
    ln_w = jnp.ones((EMBED,), jnp.float32)
    ln_b = jnp.zeros((EMBED,), jnp.float32)
    head_b = jnp.zeros((CLASSES,), jnp.float32)
    p["fvec"] = jnp.concatenate(
        [_pad_row(ln_w), _pad_row(ln_b), _pad_row(head_b), _pad_row(b_patch),
         jnp.zeros((4, LANE), jnp.float32)], axis=0)               # (8, 128)
    return p


# ------------------------------------ main -------------------------------------
if __name__ == "__main__":
    key = jax.random.PRNGKey(0)
    kx, kp = jax.random.split(key)
    x = jax.random.normal(kx, (BATCH, IN_CH, IMG, IMG), jnp.float32)
    params = init_params(kp)

    logits = vit_forward(x, params)
    jax.block_until_ready(logits)
    assert logits.shape == (BATCH, CLASSES), logits.shape
    print("KERNEL_OK")
</pallas_src>

<mosaic_0001>
module attributes {stable_mosaic.version = 11 : i64} {
  func.func @_vit_kernel(%arg0: i32, %arg1: memref<8x192xf32, #tpu.memory_space<vmem>>, %arg2: memref<192x32xf32, #tpu.memory_space<vmem>>, %arg3: memref<5x32xf32, #tpu.memory_space<vmem>>, %arg4: memref<2x32x96xf32, #tpu.memory_space<vmem>>, %arg5: memref<2x32x32xf32, #tpu.memory_space<vmem>>, %arg6: memref<2x32x64xf32, #tpu.memory_space<vmem>>, %arg7: memref<2x64x32xf32, #tpu.memory_space<vmem>>, %arg8: memref<2x8x128xf32, #tpu.memory_space<vmem>>, %arg9: memref<32x128xf32, #tpu.memory_space<vmem>>, %arg10: memref<8x128xf32, #tpu.memory_space<vmem>>, %arg11: memref<2x128xf32, #tpu.memory_space<vmem>>) attributes {dimension_semantics = [#tpu.dimension_semantics<arbitrary>], iteration_bounds = array<i64: 1>, scalar_prefetch = 0 : i64, scratch_operands = 0 : i64, tpu.core_type = #tpu.core_type<tc>, window_params = [{pipeline_mode = #tpu.pipeline_mode<synchronous>, transform_indices = @transform_0, window_bounds = array<i64: 8, 192>}, {pipeline_mode = #tpu.pipeline_mode<synchronous>, transform_indices = @transform_1, window_bounds = array<i64: 192, 32>}, {pipeline_mode = #tpu.pipeline_mode<synchronous>, transform_indices = @transform_2, window_bounds = array<i64: 5, 32>}, {pipeline_mode = #tpu.pipeline_mode<synchronous>, transform_indices = @transform_3, window_bounds = array<i64: 2, 32, 96>}, {pipeline_mode = #tpu.pipeline_mode<synchronous>, transform_indices = @transform_4, window_bounds = array<i64: 2, 32, 32>}, {pipeline_mode = #tpu.pipeline_mode<synchronous>, transform_indices = @transform_5, window_bounds = array<i64: 2, 32, 64>}, {pipeline_mode = #tpu.pipeline_mode<synchronous>, transform_indices = @transform_6, window_bounds = array<i64: 2, 64, 32>}, {pipeline_mode = #tpu.pipeline_mode<synchronous>, transform_indices = @transform_7, window_bounds = array<i64: 2, 8, 128>}, {pipeline_mode = #tpu.pipeline_mode<synchronous>, transform_indices = @transform_8, window_bounds = array<i64: 32, 128>}, {pipeline_mode = #tpu.pipeline_mode<synchronous>, transform_indices = @transform_9, window_bounds = array<i64: 8, 128>}, {pipeline_mode = #tpu.pipeline_mode<synchronous>, transform_indices = @transform_10, window_bounds = array<i64: 2, 128>}]} {
    %c0 = arith.constant 0 : index
    %c0_0 = arith.constant 0 : index
    %0 = vector.load %arg10[%c0, %c0_0] : memref<8x128xf32, #tpu.memory_space<vmem>>, vector<8x128xf32>
    %1 = vector.extract_strided_slice %0 {offsets = [3, 0], sizes = [1, 32], strides = [1, 1]} : vector<8x128xf32> to vector<1x32xf32>
    %c0_1 = arith.constant 0 : index
    %c0_2 = arith.constant 0 : index
    %2 = vector.load %arg1[%c0_1, %c0_2] : memref<8x192xf32, #tpu.memory_space<vmem>>, vector<8x192xf32>
    %c0_3 = arith.constant 0 : index
    %c0_4 = arith.constant 0 : index
    %3 = vector.load %arg2[%c0_3, %c0_4] : memref<192x32xf32, #tpu.memory_space<vmem>>, vector<192x32xf32>
    %cst = arith.constant dense<0.000000e+00> : vector<8x32xf32>
    %4 = tpu.matmul %2, %3, %cst {dimension_numbers = #tpu.dot_dimension_numbers<[1], [0], [0], [1], [0, 0, 1, 1], [], []>} : vector<8x192xf32>, vector<192x32xf32>, vector<8x32xf32> -> vector<8x32xf32>
    %5 = vector.broadcast %1 : vector<1x32xf32> to vector<8x32xf32>
    %6 = arith.addf %4, %5 : vector<8x32xf32>
    %c0_5 = arith.constant 0 : index
    %c0_6 = arith.constant 0 : index
    %7 = vector.load %arg3[%c0_5, %c0_6] : memref<5x32xf32, #tpu.memory_space<vmem>>, vector<5x32xf32>
    %8 = vector.extract_strided_slice %7 {offsets = [0, 0], sizes = [1, 32], strides = [1, 1]} : vector<5x32xf32> to vector<1x32xf32>
    %9 = vector.extract_strided_slice %6 {offsets = [0, 0], sizes = [4, 32], strides = [1, 1]} : vector<8x32xf32> to vector<4x32xf32>
    %10 = vector.extract_strided_slice %7 {offsets = [1, 0], sizes = [4, 32], strides = [1, 1]} : vector<5x32xf32> to vector<4x32xf32>
    %11 = arith.addf %9, %10 : vector<4x32xf32>
    %12 = vector.extract_strided_slice %7 {offsets = [0, 0], sizes = [1, 32], strides = [1, 1]} : vector<5x32xf32> to vector<1x32xf32>
    %13 = vector.extract_strided_slice %6 {offsets = [4, 0], sizes = [4, 32], strides = [1, 1]} : vector<8x32xf32> to vector<4x32xf32>
    %14 = vector.extract_strided_slice %7 {offsets = [1, 0], sizes = [4, 32], strides = [1, 1]} : vector<5x32xf32> to vector<4x32xf32>
    %15 = arith.addf %13, %14 : vector<4x32xf32>
    %16 = tpu.concatenate %8, %11, %12, %15 in 0 : vector<1x32xf32>, vector<4x32xf32>, vector<1x32xf32>, vector<4x32xf32> -> vector<10x32xf32>
    %c0_7 = arith.constant 0 : index
    %c0_8 = arith.constant 0 : index
    %c0_9 = arith.constant 0 : index
    %17 = vector.load %arg8[%c0_7, %c0_8, %c0_9] : memref<2x8x128xf32, #tpu.memory_space<vmem>>, vector<1x8x128xf32>
    %18 = vector.shape_cast %17 : vector<1x8x128xf32> to vector<8x128xf32>
    %19 = vector.extract_strided_slice %18 {offsets = [0, 0], sizes = [1, 32], strides = [1, 1]} : vector<8x128xf32> to vector<1x32xf32>
    %20 = vector.extract_strided_slice %18 {offsets = [1, 0], sizes = [1, 32], strides = [1, 1]} : vector<8x128xf32> to vector<1x32xf32>
    %21 = vector.extract_strided_slice %18 {offsets = [2, 0], sizes = [1, 32], strides = [1, 1]} : vector<8x128xf32> to vector<1x32xf32>
    %22 = vector.extract_strided_slice %18 {offsets = [3, 0], sizes = [1, 32], strides = [1, 1]} : vector<8x128xf32> to vector<1x32xf32>
    %23 = vector.extract_strided_slice %18 {offsets = [4, 0], sizes = [1, 96], strides = [1, 1]} : vector<8x128xf32> to vector<1x96xf32>
    %24 = vector.extract_strided_slice %18 {offsets = [5, 0], sizes = [1, 32], strides = [1, 1]} : vector<8x128xf32> to vector<1x32xf32>
    %25 = vector.extract_strided_slice %18 {offsets = [6, 0], sizes = [1, 64], strides = [1, 1]} : vector<8x128xf32> to vector<1x64xf32>
    %26 = vector.extract_strided_slice %18 {offsets = [7, 0], sizes = [1, 32], strides = [1, 1]} : vector<8x128xf32> to vector<1x32xf32>
    %cst_10 = arith.constant dense<0.000000e+00> : vector<10xf32>
    %27 = vector.multi_reduction <add>, %16, %cst_10 [1] : vector<10x32xf32> to vector<10xf32>
    %28 = vector.shape_cast %27 : vector<10xf32> to vector<10x1xf32>
    %cst_11 = arith.constant 3.200000e+01 : f32
    %29 = vector.broadcast %cst_11 : f32 to vector<10x1xf32>
    %30 = arith.divf %28, %29 : vector<10x1xf32>
    %31 = vector.broadcast %30 : vector<10x1xf32> to vector<10x32xf32>
    %32 = arith.subf %16, %31 : vector<10x32xf32>
    %33 = arith.mulf %32, %32 : vector<10x32xf32>
    %cst_12 = arith.constant dense<0.000000e+00> : vector<10xf32>
    %34 = vector.multi_reduction <add>, %33, %cst_12 [1] : vector<10x32xf32> to vector<10xf32>
    %35 = vector.shape_cast %34 : vector<10xf32> to vector<10x1xf32>
    %cst_13 = arith.constant 3.200000e+01 : f32
    %36 = vector.broadcast %cst_13 : f32 to vector<10x1xf32>
    %37 = arith.divf %35, %36 : vector<10x1xf32>
    %38 = vector.broadcast %30 : vector<10x1xf32> to vector<10x32xf32>
    %39 = arith.subf %16, %38 : vector<10x32xf32>
    %cst_14 = arith.constant 9.99999997E-7 : f32
    %40 = vector.broadcast %cst_14 : f32 to vector<10x1xf32>
    %41 = arith.addf %37, %40 : vector<10x1xf32>
    %42 = math.rsqrt %41 : vector<10x1xf32>
    %43 = vector.broadcast %42 : vector<10x1xf32> to vector<10x32xf32>
    %44 = arith.mulf %39, %43 : vector<10x32xf32>
    %45 = vector.broadcast %19 : vector<1x32xf32> to vector<10x32xf32>
    %46 = arith.mulf %44, %45 : vector<10x32xf32>
    %47 = vector.broadcast %20 : vector<1x32xf32> to vector<10x32xf32>
    %48 = arith.addf %46, %47 : vector<10x32xf32>
    %c0_15 = arith.constant 0 : index
    %c0_16 = arith.constant 0 : index
    %c0_17 = arith.constant 0 : index
    %49 = vector.load %arg4[%c0_15, %c0_16, %c0_17] : memref<2x32x96xf32, #tpu.memory_space<vmem>>, vector<1x32x96xf32>
    %50 = vector.shape_cast %49 : vector<1x32x96xf32> to vector<32x96xf32>
    %cst_18 = arith.constant dense<0.000000e+00> : vector<10x96xf32>
    %51 = tpu.matmul %48, %50, %cst_18 {dimension_numbers = #tpu.dot_dimension_numbers<[1], [0], [0], [1], [0, 0, 1, 1], [], []>} : vector<10x32xf32>, vector<32x96xf32>, vector<10x96xf32> -> vector<10x96xf32>
    %52 = vector.broadcast %23 : vector<1x96xf32> to vector<10x96xf32>
    %53 = arith.addf %51, %52 : vector<10x96xf32>
    %54 = vector.extract_strided_slice %53 {offsets = [0, 0], sizes = [10, 32], strides = [1, 1]} : vector<10x96xf32> to vector<10x32xf32>
    %55 = vector.extract_strided_slice %53 {offsets = [0, 32], sizes = [10, 32], strides = [1, 1]} : vector<10x96xf32> to vector<10x32xf32>
    %56 = vector.extract_strided_slice %53 {offsets = [0, 64], sizes = [10, 32], strides = [1, 1]} : vector<10x96xf32> to vector<10x32xf32>
    %57 = vector.extract_strided_slice %54 {offsets = [0, 0], sizes = [5, 8], strides = [1, 1]} : vector<10x32xf32> to vector<5x8xf32>
    %58 = vector.extract_strided_slice %55 {offsets = [0, 0], sizes = [5, 8], strides = [1, 1]} : vector<10x32xf32> to vector<5x8xf32>
    %59 = vector.extract_strided_slice %56 {offsets = [0, 0], sizes = [5, 8], strides = [1, 1]} : vector<10x32xf32> to vector<5x8xf32>
    %cst_19 = arith.constant dense<0.000000e+00> : vector<5x5xf32>
    %60 = tpu.matmul %57, %58, %cst_19 {dimension_numbers = #tpu.dot_dimension_numbers<[1], [1], [0], [0], [0, 0, 1, 0], [], []>} : vector<5x8xf32>, vector<5x8xf32>, vector<5x5xf32> -> vector<5x5xf32>
    %cst_20 = arith.constant 0.353553385 : f32
    %61 = vector.broadcast %cst_20 : f32 to vector<5x5xf32>
    %62 = arith.mulf %60, %61 : vector<5x5xf32>
    %cst_21 = arith.constant dense<0xFF800000> : vector<5xf32>
    %63 = vector.multi_reduction <maximumf>, %62, %cst_21 [1] : vector<5x5xf32> to vector<5xf32>
    %64 = vector.shape_cast %63 : vector<5xf32> to vector<5x1xf32>
    %65 = vector.broadcast %64 : vector<5x1xf32> to vector<5x5xf32>
    %66 = arith.subf %62, %65 : vector<5x5xf32>
    %67 = math.exp %66 : vector<5x5xf32>
    %cst_22 = arith.constant dense<0.000000e+00> : vector<5xf32>
    %68 = vector.multi_reduction <add>, %67, %cst_22 [1] : vector<5x5xf32> to vector<5xf32>
    %69 = vector.shape_cast %68 : vector<5xf32> to vector<5x1xf32>
    %70 = vector.broadcast %69 : vector<5x1xf32> to vector<5x5xf32>
    %71 = arith.divf %67, %70 : vector<5x5xf32>
    %cst_23 = arith.constant dense<0.000000e+00> : vector<5x8xf32>
    %72 = tpu.matmul %71, %59, %cst_23 {dimension_numbers = #tpu.dot_dimension_numbers<[1], [0], [0], [1], [0, 0, 1, 1], [], []>} : vector<5x5xf32>, vector<5x8xf32>, vector<5x8xf32> -> vector<5x8xf32>
    %73 = vector.extract_strided_slice %54 {offsets = [0, 8], sizes = [5, 8], strides = [1, 1]} : vector<10x32xf32> to vector<5x8xf32>
    %74 = vector.extract_strided_slice %55 {offsets = [0, 8], sizes = [5, 8], strides = [1, 1]} : vector<10x32xf32> to vector<5x8xf32>
    %75 = vector.extract_strided_slice %56 {offsets = [0, 8], sizes = [5, 8], strides = [1, 1]} : vector<10x32xf32> to vector<5x8xf32>
    %cst_24 = arith.constant dense<0.000000e+00> : vector<5x5xf32>
    %76 = tpu.matmul %73, %74, %cst_24 {dimension_numbers = #tpu.dot_dimension_numbers<[1], [1], [0], [0], [0, 0, 1, 0], [], []>} : vector<5x8xf32>, vector<5x8xf32>, vector<5x5xf32> -> vector<5x5xf32>
    %cst_25 = arith.constant 0.353553385 : f32
    %77 = vector.broadcast %cst_25 : f32 to vector<5x5xf32>
    %78 = arith.mulf %76, %77 : vector<5x5xf32>
    %cst_26 = arith.constant dense<0xFF800000> : vector<5xf32>
    %79 = vector.multi_reduction <maximumf>, %78, %cst_26 [1] : vector<5x5xf32> to vector<5xf32>
    %80 = vector.shape_cast %79 : vector<5xf32> to vector<5x1xf32>
    %81 = vector.broadcast %80 : vector<5x1xf32> to vector<5x5xf32>
    %82 = arith.subf %78, %81 : vector<5x5xf32>
    %83 = math.exp %82 : vector<5x5xf32>
    %cst_27 = arith.constant dense<0.000000e+00> : vector<5xf32>
    %84 = vector.multi_reduction <add>, %83, %cst_27 [1] : vector<5x5xf32> to vector<5xf32>
    %85 = vector.shape_cast %84 : vector<5xf32> to vector<5x1xf32>
    %86 = vector.broadcast %85 : vector<5x1xf32> to vector<5x5xf32>
    %87 = arith.divf %83, %86 : vector<5x5xf32>
    %cst_28 = arith.constant dense<0.000000e+00> : vector<5x8xf32>
    %88 = tpu.matmul %87, %75, %cst_28 {dimension_numbers = #tpu.dot_dimension_numbers<[1], [0], [0], [1], [0, 0, 1, 1], [], []>} : vector<5x5xf32>, vector<5x8xf32>, vector<5x8xf32> -> vector<5x8xf32>
    %89 = vector.extract_strided_slice %54 {offsets = [0, 16], sizes = [5, 8], strides = [1, 1]} : vector<10x32xf32> to vector<5x8xf32>
    %90 = vector.extract_strided_slice %55 {offsets = [0, 16], sizes = [5, 8], strides = [1, 1]} : vector<10x32xf32> to vector<5x8xf32>
    %91 = vector.extract_strided_slice %56 {offsets = [0, 16], sizes = [5, 8], strides = [1, 1]} : vector<10x32xf32> to vector<5x8xf32>
    %cst_29 = arith.constant dense<0.000000e+00> : vector<5x5xf32>
    %92 = tpu.matmul %89, %90, %cst_29 {dimension_numbers = #tpu.dot_dimension_numbers<[1], [1], [0], [0], [0, 0, 1, 0], [], []>} : vector<5x8xf32>, vector<5x8xf32>, vector<5x5xf32> -> vector<5x5xf32>
    %cst_30 = arith.constant 0.353553385 : f32
    %93 = vector.broadcast %cst_30 : f32 to vector<5x5xf32>
    %94 = arith.mulf %92, %93 : vector<5x5xf32>
    %cst_31 = arith.constant dense<0xFF800000> : vector<5xf32>
    %95 = vector.multi_reduction <maximumf>, %94, %cst_31 [1] : vector<5x5xf32> to vector<5xf32>
    %96 = vector.shape_cast %95 : vector<5xf32> to vector<5x1xf32>
    %97 = vector.broadcast %96 : vector<5x1xf32> to vector<5x5xf32>
    %98 = arith.subf %94, %97 : vector<5x5xf32>
    %99 = math.exp %98 : vector<5x5xf32>
    %cst_32 = arith.constant dense<0.000000e+00> : vector<5xf32>
    %100 = vector.multi_reduction <add>, %99, %cst_32 [1] : vector<5x5xf32> to vector<5xf32>
    %101 = vector.shape_cast %100 : vector<5xf32> to vector<5x1xf32>
    %102 = vector.broadcast %101 : vector<5x1xf32> to vector<5x5xf32>
    %103 = arith.divf %99, %102 : vector<5x5xf32>
    %cst_33 = arith.constant dense<0.000000e+00> : vector<5x8xf32>
    %104 = tpu.matmul %103, %91, %cst_33 {dimension_numbers = #tpu.dot_dimension_numbers<[1], [0], [0], [1], [0, 0, 1, 1], [], []>} : vector<5x5xf32>, vector<5x8xf32>, vector<5x8xf32> -> vector<5x8xf32>
    %105 = vector.extract_strided_slice %54 {offsets = [0, 24], sizes = [5, 8], strides = [1, 1]} : vector<10x32xf32> to vector<5x8xf32>
    %106 = vector.extract_strided_slice %55 {offsets = [0, 24], sizes = [5, 8], strides = [1, 1]} : vector<10x32xf32> to vector<5x8xf32>
    %107 = vector.extract_strided_slice %56 {offsets = [0, 24], sizes = [5, 8], strides = [1, 1]} : vector<10x32xf32> to vector<5x8xf32>
    %cst_34 = arith.constant dense<0.000000e+00> : vector<5x5xf32>
    %108 = tpu.matmul %105, %106, %cst_34 {dimension_numbers = #tpu.dot_dimension_numbers<[1], [1], [0], [0], [0, 0, 1, 0], [], []>} : vector<5x8xf32>, vector<5x8xf32>, vector<5x5xf32> -> vector<5x5xf32>
    %cst_35 = arith.constant 0.353553385 : f32
    %109 = vector.broadcast %cst_35 : f32 to vector<5x5xf32>
    %110 = arith.mulf %108, %109 : vector<5x5xf32>
    %cst_36 = arith.constant dense<0xFF800000> : vector<5xf32>
    %111 = vector.multi_reduction <maximumf>, %110, %cst_36 [1] : vector<5x5xf32> to vector<5xf32>
    %112 = vector.shape_cast %111 : vector<5xf32> to vector<5x1xf32>
    %113 = vector.broadcast %112 : vector<5x1xf32> to vector<5x5xf32>
    %114 = arith.subf %110, %113 : vector<5x5xf32>
    %115 = math.exp %114 : vector<5x5xf32>
    %cst_37 = arith.constant dense<0.000000e+00> : vector<5xf32>
    %116 = vector.multi_reduction <add>, %115, %cst_37 [1] : vector<5x5xf32> to vector<5xf32>
    %117 = vector.shape_cast %116 : vector<5xf32> to vector<5x1xf32>
    %118 = vector.broadcast %117 : vector<5x1xf32> to vector<5x5xf32>
    %119 = arith.divf %115, %118 : vector<5x5xf32>
    %cst_38 = arith.constant dense<0.000000e+00> : vector<5x8xf32>
    %120 = tpu.matmul %119, %107, %cst_38 {dimension_numbers = #tpu.dot_dimension_numbers<[1], [0], [0], [1], [0, 0, 1, 1], [], []>} : vector<5x5xf32>, vector<5x8xf32>, vector<5x8xf32> -> vector<5x8xf32>
    %121 = tpu.concatenate %72, %88, %104, %120 in 1 : vector<5x8xf32>, vector<5x8xf32>, vector<5x8xf32>, vector<5x8xf32> -> vector<5x32xf32>
    %122 = vector.extract_strided_slice %54 {offsets = [5, 0], sizes = [5, 8], strides = [1, 1]} : vector<10x32xf32> to vector<5x8xf32>
    %123 = vector.extract_strided_slice %55 {offsets = [5, 0], sizes = [5, 8], strides = [1, 1]} : vector<10x32xf32> to vector<5x8xf32>
    %124 = vector.extract_strided_slice %56 {offsets = [5, 0], sizes = [5, 8], strides = [1, 1]} : vector<10x32xf32> to vector<5x8xf32>
    %cst_39 = arith.constant dense<0.000000e+00> : vector<5x5xf32>
    %125 = tpu.matmul %122, %123, %cst_39 {dimension_numbers = #tpu.dot_dimension_numbers<[1], [1], [0], [0], [0, 0, 1, 0], [], []>} : vector<5x8xf32>, vector<5x8xf32>, vector<5x5xf32> -> vector<5x5xf32>
    %cst_40 = arith.constant 0.353553385 : f32
    %126 = vector.broadcast %cst_40 : f32 to vector<5x5xf32>
    %127 = arith.mulf %125, %126 : vector<5x5xf32>
    %cst_41 = arith.constant dense<0xFF800000> : vector<5xf32>
    %128 = vector.multi_reduction <maximumf>, %127, %cst_41 [1] : vector<5x5xf32> to vector<5xf32>
    %129 = vector.shape_cast %128 : vector<5xf32> to vector<5x1xf32>
    %130 = vector.broadcast %129 : vector<5x1xf32> to vector<5x5xf32>
    %131 = arith.subf %127, %130 : vector<5x5xf32>
    %132 = math.exp %131 : vector<5x5xf32>
    %cst_42 = arith.constant dense<0.000000e+00> : vector<5xf32>
    %133 = vector.multi_reduction <add>, %132, %cst_42 [1] : vector<5x5xf32> to vector<5xf32>
    %134 = vector.shape_cast %133 : vector<5xf32> to vector<5x1xf32>
    %135 = vector.broadcast %134 : vector<5x1xf32> to vector<5x5xf32>
    %136 = arith.divf %132, %135 : vector<5x5xf32>
    %cst_43 = arith.constant dense<0.000000e+00> : vector<5x8xf32>
    %137 = tpu.matmul %136, %124, %cst_43 {dimension_numbers = #tpu.dot_dimension_numbers<[1], [0], [0], [1], [0, 0, 1, 1], [], []>} : vector<5x5xf32>, vector<5x8xf32>, vector<5x8xf32> -> vector<5x8xf32>
    %138 = vector.extract_strided_slice %54 {offsets = [5, 8], sizes = [5, 8], strides = [1, 1]} : vector<10x32xf32> to vector<5x8xf32>
    %139 = vector.extract_strided_slice %55 {offsets = [5, 8], sizes = [5, 8], strides = [1, 1]} : vector<10x32xf32> to vector<5x8xf32>
    %140 = vector.extract_strided_slice %56 {offsets = [5, 8], sizes = [5, 8], strides = [1, 1]} : vector<10x32xf32> to vector<5x8xf32>
    %cst_44 = arith.constant dense<0.000000e+00> : vector<5x5xf32>
    %141 = tpu.matmul %138, %139, %cst_44 {dimension_numbers = #tpu.dot_dimension_numbers<[1], [1], [0], [0], [0, 0, 1, 0], [], []>} : vector<5x8xf32>, vector<5x8xf32>, vector<5x5xf32> -> vector<5x5xf32>
    %cst_45 = arith.constant 0.353553385 : f32
    %142 = vector.broadcast %cst_45 : f32 to vector<5x5xf32>
    %143 = arith.mulf %141, %142 : vector<5x5xf32>
    %cst_46 = arith.constant dense<0xFF800000> : vector<5xf32>
    %144 = vector.multi_reduction <maximumf>, %143, %cst_46 [1] : vector<5x5xf32> to vector<5xf32>
    %145 = vector.shape_cast %144 : vector<5xf32> to vector<5x1xf32>
    %146 = vector.broadcast %145 : vector<5x1xf32> to vector<5x5xf32>
    %147 = arith.subf %143, %146 : vector<5x5xf32>
    %148 = math.exp %147 : vector<5x5xf32>
    %cst_47 = arith.constant dense<0.000000e+00> : vector<5xf32>
    %149 = vector.multi_reduction <add>, %148, %cst_47 [1] : vector<5x5xf32> to vector<5xf32>
    %150 = vector.shape_cast %149 : vector<5xf32> to vector<5x1xf32>
    %151 = vector.broadcast %150 : vector<5x1xf32> to vector<5x5xf32>
    %152 = arith.divf %148, %151 : vector<5x5xf32>
    %cst_48 = arith.constant dense<0.000000e+00> : vector<5x8xf32>
    %153 = tpu.matmul %152, %140, %cst_48 {dimension_numbers = #tpu.dot_dimension_numbers<[1], [0], [0], [1], [0, 0, 1, 1], [], []>} : vector<5x5xf32>, vector<5x8xf32>, vector<5x8xf32> -> vector<5x8xf32>
    %154 = vector.extract_strided_slice %54 {offsets = [5, 16], sizes = [5, 8], strides = [1, 1]} : vector<10x32xf32> to vector<5x8xf32>
    %155 = vector.extract_strided_slice %55 {offsets = [5, 16], sizes = [5, 8], strides = [1, 1]} : vector<10x32xf32> to vector<5x8xf32>
    %156 = vector.extract_strided_slice %56 {offsets = [5, 16], sizes = [5, 8], strides = [1, 1]} : vector<10x32xf32> to vector<5x8xf32>
    %cst_49 = arith.constant dense<0.000000e+00> : vector<5x5xf32>
    %157 = tpu.matmul %154, %155, %cst_49 {dimension_numbers = #tpu.dot_dimension_numbers<[1], [1], [0], [0], [0, 0, 1, 0], [], []>} : vector<5x8xf32>, vector<5x8xf32>, vector<5x5xf32> -> vector<5x5xf32>
    %cst_50 = arith.constant 0.353553385 : f32
    %158 = vector.broadcast %cst_50 : f32 to vector<5x5xf32>
    %159 = arith.mulf %157, %158 : vector<5x5xf32>
    %cst_51 = arith.constant dense<0xFF800000> : vector<5xf32>
    %160 = vector.multi_reduction <maximumf>, %159, %cst_51 [1] : vector<5x5xf32> to vector<5xf32>
    %161 = vector.shape_cast %160 : vector<5xf32> to vector<5x1xf32>
    %162 = vector.broadcast %161 : vector<5x1xf32> to vector<5x5xf32>
    %163 = arith.subf %159, %162 : vector<5x5xf32>
    %164 = math.exp %163 : vector<5x5xf32>
    %cst_52 = arith.constant dense<0.000000e+00> : vector<5xf32>
    %165 = vector.multi_reduction <add>, %164, %cst_52 [1] : vector<5x5xf32> to vector<5xf32>
    %166 = vector.shape_cast %165 : vector<5xf32> to vector<5x1xf32>
    %167 = vector.broadcast %166 : vector<5x1xf32> to vector<5x5xf32>
    %168 = arith.divf %164, %167 : vector<5x5xf32>
    %cst_53 = arith.constant dense<0.000000e+00> : vector<5x8xf32>
    %169 = tpu.matmul %168, %156, %cst_53 {dimension_numbers = #tpu.dot_dimension_numbers<[1], [0], [0], [1], [0, 0, 1, 1], [], []>} : vector<5x5xf32>, vector<5x8xf32>, vector<5x8xf32> -> vector<5x8xf32>
    %170 = vector.extract_strided_slice %54 {offsets = [5, 24], sizes = [5, 8], strides = [1, 1]} : vector<10x32xf32> to vector<5x8xf32>
    %171 = vector.extract_strided_slice %55 {offsets = [5, 24], sizes = [5, 8], strides = [1, 1]} : vector<10x32xf32> to vector<5x8xf32>
    %172 = vector.extract_strided_slice %56 {offsets = [5, 24], sizes = [5, 8], strides = [1, 1]} : vector<10x32xf32> to vector<5x8xf32>
    %cst_54 = arith.constant dense<0.000000e+00> : vector<5x5xf32>
    %173 = tpu.matmul %170, %171, %cst_54 {dimension_numbers = #tpu.dot_dimension_numbers<[1], [1], [0], [0], [0, 0, 1, 0], [], []>} : vector<5x8xf32>, vector<5x8xf32>, vector<5x5xf32> -> vector<5x5xf32>
    %cst_55 = arith.constant 0.353553385 : f32
    %174 = vector.broadcast %cst_55 : f32 to vector<5x5xf32>
    %175 = arith.mulf %173, %174 : vector<5x5xf32>
    %cst_56 = arith.constant dense<0xFF800000> : vector<5xf32>
    %176 = vector.multi_reduction <maximumf>, %175, %cst_56 [1] : vector<5x5xf32> to vector<5xf32>
    %177 = vector.shape_cast %176 : vector<5xf32> to vector<5x1xf32>
    %178 = vector.broadcast %177 : vector<5x1xf32> to vector<5x5xf32>
    %179 = arith.subf %175, %178 : vector<5x5xf32>
    %180 = math.exp %179 : vector<5x5xf32>
    %cst_57 = arith.constant dense<0.000000e+00> : vector<5xf32>
    %181 = vector.multi_reduction <add>, %180, %cst_57 [1] : vector<5x5xf32> to vector<5xf32>
    %182 = vector.shape_cast %181 : vector<5xf32> to vector<5x1xf32>
    %183 = vector.broadcast %182 : vector<5x1xf32> to vector<5x5xf32>
    %184 = arith.divf %180, %183 : vector<5x5xf32>
    %cst_58 = arith.constant dense<0.000000e+00> : vector<5x8xf32>
    %185 = tpu.matmul %184, %172, %cst_58 {dimension_numbers = #tpu.dot_dimension_numbers<[1], [0], [0], [1], [0, 0, 1, 1], [], []>} : vector<5x5xf32>, vector<5x8xf32>, vector<5x8xf32> -> vector<5x8xf32>
    %186 = tpu.concatenate %137, %153, %169, %185 in 1 : vector<5x8xf32>, vector<5x8xf32>, vector<5x8xf32>, vector<5x8xf32> -> vector<5x32xf32>
    %187 = tpu.concatenate %121, %186 in 0 : vector<5x32xf32>, vector<5x32xf32> -> vector<10x32xf32>
    %c0_59 = arith.constant 0 : index
    %c0_60 = arith.constant 0 : index
    %c0_61 = arith.constant 0 : index
    %188 = vector.load %arg5[%c0_59, %c0_60, %c0_61] : memref<2x32x32xf32, #tpu.memory_space<vmem>>, vector<1x32x32xf32>
    %189 = vector.shape_cast %188 : vector<1x32x32xf32> to vector<32x32xf32>
    %cst_62 = arith.constant dense<0.000000e+00> : vector<10x32xf32>
    %190 = tpu.matmul %187, %189, %cst_62 {dimension_numbers = #tpu.dot_dimension_numbers<[1], [0], [0], [1], [0, 0, 1, 1], [], []>} : vector<10x32xf32>, vector<32x32xf32>, vector<10x32xf32> -> vector<10x32xf32>
    %191 = arith.addf %16, %190 : vector<10x32xf32>
    %192 = vector.broadcast %24 : vector<1x32xf32> to vector<10x32xf32>
    %193 = arith.addf %191, %192 : vector<10x32xf32>
    %cst_63 = arith.constant dense<0.000000e+00> : vector<10xf32>
    %194 = vector.multi_reduction <add>, %193, %cst_63 [1] : vector<10x32xf32> to vector<10xf32>
    %195 = vector.shape_cast %194 : vector<10xf32> to vector<10x1xf32>
    %cst_64 = arith.constant 3.200000e+01 : f32
    %196 = vector.broadcast %cst_64 : f32 to vector<10x1xf32>
    %197 = arith.divf %195, %196 : vector<10x1xf32>
    %198 = vector.broadcast %197 : vector<10x1xf32> to vector<10x32xf32>
    %199 = arith.subf %193, %198 : vector<10x32xf32>
    %200 = arith.mulf %199, %199 : vector<10x32xf32>
    %cst_65 = arith.constant dense<0.000000e+00> : vector<10xf32>
    %201 = vector.multi_reduction <add>, %200, %cst_65 [1] : vector<10x32xf32> to vector<10xf32>
    %202 = vector.shape_cast %201 : vector<10xf32> to vector<10x1xf32>
    %cst_66 = arith.constant 3.200000e+01 : f32
    %203 = vector.broadcast %cst_66 : f32 to vector<10x1xf32>
    %204 = arith.divf %202, %203 : vector<10x1xf32>
    %205 = vector.broadcast %197 : vector<10x1xf32> to vector<10x32xf32>
    %206 = arith.subf %193, %205 : vector<10x32xf32>
    %cst_67 = arith.constant 9.99999997E-7 : f32
    %207 = vector.broadcast %cst_67 : f32 to vector<10x1xf32>
    %208 = arith.addf %204, %207 : vector<10x1xf32>
    %209 = math.rsqrt %208 : vector<10x1xf32>
    %210 = vector.broadcast %209 : vector<10x1xf32> to vector<10x32xf32>
    %211 = arith.mulf %206, %210 : vector<10x32xf32>
    %212 = vector.broadcast %21 : vector<1x32xf32> to vector<10x32xf32>
    %213 = arith.mulf %211, %212 : vector<10x32xf32>
    %214 = vector.broadcast %22 : vector<1x32xf32> to vector<10x32xf32>
    %215 = arith.addf %213, %214 : vector<10x32xf32>
    %c0_68 = arith.constant 0 : index
    %c0_69 = arith.constant 0 : index
    %c0_70 = arith.constant 0 : index
    %216 = vector.load %arg6[%c0_68, %c0_69, %c0_70] : memref<2x32x64xf32, #tpu.memory_space<vmem>>, vector<1x32x64xf32>
    %217 = vector.shape_cast %216 : vector<1x32x64xf32> to vector<32x64xf32>
    %cst_71 = arith.constant dense<0.000000e+00> : vector<10x64xf32>
    %218 = tpu.matmul %215, %217, %cst_71 {dimension_numbers = #tpu.dot_dimension_numbers<[1], [0], [0], [1], [0, 0, 1, 1], [], []>} : vector<10x32xf32>, vector<32x64xf32>, vector<10x64xf32> -> vector<10x64xf32>
    %219 = vector.broadcast %25 : vector<1x64xf32> to vector<10x64xf32>
    %220 = arith.addf %218, %219 : vector<10x64xf32>
    %cst_72 = arith.constant 5.000000e-01 : f32
    %221 = vector.broadcast %cst_72 : f32 to vector<10x64xf32>
    %222 = arith.mulf %221, %220 : vector<10x64xf32>
    %cst_73 = arith.constant 0.707106769 : f32
    %223 = vector.broadcast %cst_73 : f32 to vector<10x64xf32>
    %224 = arith.mulf %220, %223 : vector<10x64xf32>
    %225 = math.erf %224 : vector<10x64xf32>
    %cst_74 = arith.constant 1.000000e+00 : f32
    %226 = vector.broadcast %cst_74 : f32 to vector<10x64xf32>
    %227 = arith.addf %226, %225 : vector<10x64xf32>
    %228 = arith.mulf %222, %227 : vector<10x64xf32>
    %c0_75 = arith.constant 0 : index
    %c0_76 = arith.constant 0 : index
    %c0_77 = arith.constant 0 : index
    %229 = vector.load %arg7[%c0_75, %c0_76, %c0_77] : memref<2x64x32xf32, #tpu.memory_space<vmem>>, vector<1x64x32xf32>
    %230 = vector.shape_cast %229 : vector<1x64x32xf32> to vector<64x32xf32>
    %cst_78 = arith.constant dense<0.000000e+00> : vector<10x32xf32>
    %231 = tpu.matmul %228, %230, %cst_78 {dimension_numbers = #tpu.dot_dimension_numbers<[1], [0], [0], [1], [0, 0, 1, 1], [], []>} : vector<10x64xf32>, vector<64x32xf32>, vector<10x32xf32> -> vector<10x32xf32>
    %232 = arith.addf %193, %231 : vector<10x32xf32>
    %233 = vector.broadcast %26 : vector<1x32xf32> to vector<10x32xf32>
    %234 = arith.addf %232, %233 : vector<10x32xf32>
    %c1 = arith.constant 1 : index
    %c0_79 = arith.constant 0 : index
    %c0_80 = arith.constant 0 : index
    %235 = vector.load %arg8[%c1, %c0_79, %c0_80] : memref<2x8x128xf32, #tpu.memory_space<vmem>>, vector<1x8x128xf32>
    %236 = vector.shape_cast %235 : vector<1x8x128xf32> to vector<8x128xf32>
    %237 = vector.extract_strided_slice %236 {offsets = [0, 0], sizes = [1, 32], strides = [1, 1]} : vector<8x128xf32> to vector<1x32xf32>
    %238 = vector.extract_strided_slice %236 {offsets = [1, 0], sizes = [1, 32], strides = [1, 1]} : vector<8x128xf32> to vector<1x32xf32>
    %239 = vector.extract_strided_slice %236 {offsets = [2, 0], sizes = [1, 32], strides = [1, 1]} : vector<8x128xf32> to vector<1x32xf32>
    %240 = vector.extract_strided_slice %236 {offsets = [3, 0], sizes = [1, 32], strides = [1, 1]} : vector<8x128xf32> to vector<1x32xf32>
    %241 = vector.extract_strided_slice %236 {offsets = [4, 0], sizes = [1, 96], strides = [1, 1]} : vector<8x128xf32> to vector<1x96xf32>
    %242 = vector.extract_strided_slice %236 {offsets = [5, 0], sizes = [1, 32], strides = [1, 1]} : vector<8x128xf32> to vector<1x32xf32>
    %243 = vector.extract_strided_slice %236 {offsets = [6, 0], sizes = [1, 64], strides = [1, 1]} : vector<8x128xf32> to vector<1x64xf32>
    %244 = vector.extract_strided_slice %236 {offsets = [7, 0], sizes = [1, 32], strides = [1, 1]} : vector<8x128xf32> to vector<1x32xf32>
    %cst_81 = arith.constant dense<0.000000e+00> : vector<10xf32>
    %245 = vector.multi_reduction <add>, %234, %cst_81 [1] : vector<10x32xf32> to vector<10xf32>
    %246 = vector.shape_cast %245 : vector<10xf32> to vector<10x1xf32>
    %cst_82 = arith.constant 3.200000e+01 : f32
    %247 = vector.broadcast %cst_82 : f32 to vector<10x1xf32>
    %248 = arith.divf %246, %247 : vector<10x1xf32>
    %249 = vector.broadcast %248 : vector<10x1xf32> to vector<10x32xf32>
    %250 = arith.subf %234, %249 : vector<10x32xf32>
    %251 = arith.mulf %250, %250 : vector<10x32xf32>
    %cst_83 = arith.constant dense<0.000000e+00> : vector<10xf32>
    %252 = vector.multi_reduction <add>, %251, %cst_83 [1] : vector<10x32xf32> to vector<10xf32>
    %253 = vector.shape_cast %252 : vector<10xf32> to vector<10x1xf32>
    %cst_84 = arith.constant 3.200000e+01 : f32
    %254 = vector.broadcast %cst_84 : f32 to vector<10x1xf32>
    %255 = arith.divf %253, %254 : vector<10x1xf32>
    %256 = vector.broadcast %248 : vector<10x1xf32> to vector<10x32xf32>
    %257 = arith.subf %234, %256 : vector<10x32xf32>
    %cst_85 = arith.constant 9.99999997E-7 : f32
    %258 = vector.broadcast %cst_85 : f32 to vector<10x1xf32>
    %259 = arith.addf %255, %258 : vector<10x1xf32>
    %260 = math.rsqrt %259 : vector<10x1xf32>
    %261 = vector.broadcast %260 : vector<10x1xf32> to vector<10x32xf32>
    %262 = arith.mulf %257, %261 : vector<10x32xf32>
    %263 = vector.broadcast %237 : vector<1x32xf32> to vector<10x32xf32>
    %264 = arith.mulf %262, %263 : vector<10x32xf32>
    %265 = vector.broadcast %238 : vector<1x32xf32> to vector<10x32xf32>
    %266 = arith.addf %264, %265 : vector<10x32xf32>
    %c1_86 = arith.constant 1 : index
    %c0_87 = arith.constant 0 : index
    %c0_88 = arith.constant 0 : index
    %267 = vector.load %arg4[%c1_86, %c0_87, %c0_88] : memref<2x32x96xf32, #tpu.memory_space<vmem>>, vector<1x32x96xf32>
    %268 = vector.shape_cast %267 : vector<1x32x96xf32> to vector<32x96xf32>
    %cst_89 = arith.constant dense<0.000000e+00> : vector<10x96xf32>
    %269 = tpu.matmul %266, %268, %cst_89 {dimension_numbers = #tpu.dot_dimension_numbers<[1], [0], [0], [1], [0, 0, 1, 1], [], []>} : vector<10x32xf32>, vector<32x96xf32>, vector<10x96xf32> -> vector<10x96xf32>
    %270 = vector.broadcast %241 : vector<1x96xf32> to vector<10x96xf32>
    %271 = arith.addf %269, %270 : vector<10x96xf32>
    %272 = vector.extract_strided_slice %271 {offsets = [0, 0], sizes = [10, 32], strides = [1, 1]} : vector<10x96xf32> to vector<10x32xf32>
    %273 = vector.extract_strided_slice %271 {offsets = [0, 32], sizes = [10, 32], strides = [1, 1]} : vector<10x96xf32> to vector<10x32xf32>
    %274 = vector.extract_strided_slice %271 {offsets = [0, 64], sizes = [10, 32], strides = [1, 1]} : vector<10x96xf32> to vector<10x32xf32>
    %275 = vector.extract_strided_slice %272 {offsets = [0, 0], sizes = [5, 8], strides = [1, 1]} : vector<10x32xf32> to vector<5x8xf32>
    %276 = vector.extract_strided_slice %273 {offsets = [0, 0], sizes = [5, 8], strides = [1, 1]} : vector<10x32xf32> to vector<5x8xf32>
    %277 = vector.extract_strided_slice %274 {offsets = [0, 0], sizes = [5, 8], strides = [1, 1]} : vector<10x32xf32> to vector<5x8xf32>
    %cst_90 = arith.constant dense<0.000000e+00> : vector<5x5xf32>
    %278 = tpu.matmul %275, %276, %cst_90 {dimension_numbers = #tpu.dot_dimension_numbers<[1], [1], [0], [0], [0, 0, 1, 0], [], []>} : vector<5x8xf32>, vector<5x8xf32>, vector<5x5xf32> -> vector<5x5xf32>
    %cst_91 = arith.constant 0.353553385 : f32
    %279 = vector.broadcast %cst_91 : f32 to vector<5x5xf32>
    %280 = arith.mulf %278, %279 : vector<5x5xf32>
    %cst_92 = arith.constant dense<0xFF800000> : vector<5xf32>
    %281 = vector.multi_reduction <maximumf>, %280, %cst_92 [1] : vector<5x5xf32> to vector<5xf32>
    %282 = vector.shape_cast %281 : vector<5xf32> to vector<5x1xf32>
    %283 = vector.broadcast %282 : vector<5x1xf32> to vector<5x5xf32>
    %284 = arith.subf %280, %283 : vector<5x5xf32>
    %285 = math.exp %284 : vector<5x5xf32>
    %cst_93 = arith.constant dense<0.000000e+00> : vector<5xf32>
    %286 = vector.multi_reduction <add>, %285, %cst_93 [1] : vector<5x5xf32> to vector<5xf32>
    %287 = vector.shape_cast %286 : vector<5xf32> to vector<5x1xf32>
    %288 = vector.broadcast %287 : vector<5x1xf32> to vector<5x5xf32>
    %289 = arith.divf %285, %288 : vector<5x5xf32>
    %cst_94 = arith.constant dense<0.000000e+00> : vector<5x8xf32>
    %290 = tpu.matmul %289, %277, %cst_94 {dimension_numbers = #tpu.dot_dimension_numbers<[1], [0], [0], [1], [0, 0, 1, 1], [], []>} : vector<5x5xf32>, vector<5x8xf32>, vector<5x8xf32> -> vector<5x8xf32>
    %291 = vector.extract_strided_slice %272 {offsets = [0, 8], sizes = [5, 8], strides = [1, 1]} : vector<10x32xf32> to vector<5x8xf32>
    %292 = vector.extract_strided_slice %273 {offsets = [0, 8], sizes = [5, 8], strides = [1, 1]} : vector<10x32xf32> to vector<5x8xf32>
    %293 = vector.extract_strided_slice %274 {offsets = [0, 8], sizes = [5, 8], strides = [1, 1]} : vector<10x32xf32> to vector<5x8xf32>
    %cst_95 = arith.constant dense<0.000000e+00> : vector<5x5xf32>
    %294 = tpu.matmul %291, %292, %cst_95 {dimension_numbers = #tpu.dot_dimension_numbers<[1], [1], [0], [0], [0, 0, 1, 0], [], []>} : vector<5x8xf32>, vector<5x8xf32>, vector<5x5xf32> -> vector<5x5xf32>
    %cst_96 = arith.constant 0.353553385 : f32
    %295 = vector.broadcast %cst_96 : f32 to vector<5x5xf32>
    %296 = arith.mulf %294, %295 : vector<5x5xf32>
    %cst_97 = arith.constant dense<0xFF800000> : vector<5xf32>
    %297 = vector.multi_reduction <maximumf>, %296, %cst_97 [1] : vector<5x5xf32> to vector<5xf32>
    %298 = vector.shape_cast %297 : vector<5xf32> to vector<5x1xf32>
    %299 = vector.broadcast %298 : vector<5x1xf32> to vector<5x5xf32>
    %300 = arith.subf %296, %299 : vector<5x5xf32>
    %301 = math.exp %300 : vector<5x5xf32>
    %cst_98 = arith.constant dense<0.000000e+00> : vector<5xf32>
    %302 = vector.multi_reduction <add>, %301, %cst_98 [1] : vector<5x5xf32> to vector<5xf32>
    %303 = vector.shape_cast %302 : vector<5xf32> to vector<5x1xf32>
    %304 = vector.broadcast %303 : vector<5x1xf32> to vector<5x5xf32>
    %305 = arith.divf %301, %304 : vector<5x5xf32>
    %cst_99 = arith.constant dense<0.000000e+00> : vector<5x8xf32>
    %306 = tpu.matmul %305, %293, %cst_99 {dimension_numbers = #tpu.dot_dimension_numbers<[1], [0], [0], [1], [0, 0, 1, 1], [], []>} : vector<5x5xf32>, vector<5x8xf32>, vector<5x8xf32> -> vector<5x8xf32>
    %307 = vector.extract_strided_slice %272 {offsets = [0, 16], sizes = [5, 8], strides = [1, 1]} : vector<10x32xf32> to vector<5x8xf32>
    %308 = vector.extract_strided_slice %273 {offsets = [0, 16], sizes = [5, 8], strides = [1, 1]} : vector<10x32xf32> to vector<5x8xf32>
    %309 = vector.extract_strided_slice %274 {offsets = [0, 16], sizes = [5, 8], strides = [1, 1]} : vector<10x32xf32> to vector<5x8xf32>
    %cst_100 = arith.constant dense<0.000000e+00> : vector<5x5xf32>
    %310 = tpu.matmul %307, %308, %cst_100 {dimension_numbers = #tpu.dot_dimension_numbers<[1], [1], [0], [0], [0, 0, 1, 0], [], []>} : vector<5x8xf32>, vector<5x8xf32>, vector<5x5xf32> -> vector<5x5xf32>
    %cst_101 = arith.constant 0.353553385 : f32
    %311 = vector.broadcast %cst_101 : f32 to vector<5x5xf32>
    %312 = arith.mulf %310, %311 : vector<5x5xf32>
    %cst_102 = arith.constant dense<0xFF800000> : vector<5xf32>
    %313 = vector.multi_reduction <maximumf>, %312, %cst_102 [1] : vector<5x5xf32> to vector<5xf32>
    %314 = vector.shape_cast %313 : vector<5xf32> to vector<5x1xf32>
    %315 = vector.broadcast %314 : vector<5x1xf32> to vector<5x5xf32>
    %316 = arith.subf %312, %315 : vector<5x5xf32>
    %317 = math.exp %316 : vector<5x5xf32>
    %cst_103 = arith.constant dense<0.000000e+00> : vector<5xf32>
    %318 = vector.multi_reduction <add>, %317, %cst_103 [1] : vector<5x5xf32> to vector<5xf32>
    %319 = vector.shape_cast %318 : vector<5xf32> to vector<5x1xf32>
    %320 = vector.broadcast %319 : vector<5x1xf32> to vector<5x5xf32>
    %321 = arith.divf %317, %320 : vector<5x5xf32>
    %cst_104 = arith.constant dense<0.000000e+00> : vector<5x8xf32>
    %322 = tpu.matmul %321, %309, %cst_104 {dimension_numbers = #tpu.dot_dimension_numbers<[1], [0], [0], [1], [0, 0, 1, 1], [], []>} : vector<5x5xf32>, vector<5x8xf32>, vector<5x8xf32> -> vector<5x8xf32>
    %323 = vector.extract_strided_slice %272 {offsets = [0, 24], sizes = [5, 8], strides = [1, 1]} : vector<10x32xf32> to vector<5x8xf32>
    %324 = vector.extract_strided_slice %273 {offsets = [0, 24], sizes = [5, 8], strides = [1, 1]} : vector<10x32xf32> to vector<5x8xf32>
    %325 = vector.extract_strided_slice %274 {offsets = [0, 24], sizes = [5, 8], strides = [1, 1]} : vector<10x32xf32> to vector<5x8xf32>
    %cst_105 = arith.constant dense<0.000000e+00> : vector<5x5xf32>
    %326 = tpu.matmul %323, %324, %cst_105 {dimension_numbers = #tpu.dot_dimension_numbers<[1], [1], [0], [0], [0, 0, 1, 0], [], []>} : vector<5x8xf32>, vector<5x8xf32>, vector<5x5xf32> -> vector<5x5xf32>
    %cst_106 = arith.constant 0.353553385 : f32
    %327 = vector.broadcast %cst_106 : f32 to vector<5x5xf32>
    %328 = arith.mulf %326, %327 : vector<5x5xf32>
    %cst_107 = arith.constant dense<0xFF800000> : vector<5xf32>
    %329 = vector.multi_reduction <maximumf>, %328, %cst_107 [1] : vector<5x5xf32> to vector<5xf32>
    %330 = vector.shape_cast %329 : vector<5xf32> to vector<5x1xf32>
    %331 = vector.broadcast %330 : vector<5x1xf32> to vector<5x5xf32>
    %332 = arith.subf %328, %331 : vector<5x5xf32>
    %333 = math.exp %332 : vector<5x5xf32>
    %cst_108 = arith.constant dense<0.000000e+00> : vector<5xf32>
    %334 = vector.multi_reduction <add>, %333, %cst_108 [1] : vector<5x5xf32> to vector<5xf32>
    %335 = vector.shape_cast %334 : vector<5xf32> to vector<5x1xf32>
    %336 = vector.broadcast %335 : vector<5x1xf32> to vector<5x5xf32>
    %337 = arith.divf %333, %336 : vector<5x5xf32>
    %cst_109 = arith.constant dense<0.000000e+00> : vector<5x8xf32>
    %338 = tpu.matmul %337, %325, %cst_109 {dimension_numbers = #tpu.dot_dimension_numbers<[1], [0], [0], [1], [0, 0, 1, 1], [], []>} : vector<5x5xf32>, vector<5x8xf32>, vector<5x8xf32> -> vector<5x8xf32>
    %339 = tpu.concatenate %290, %306, %322, %338 in 1 : vector<5x8xf32>, vector<5x8xf32>, vector<5x8xf32>, vector<5x8xf32> -> vector<5x32xf32>
    %340 = vector.extract_strided_slice %272 {offsets = [5, 0], sizes = [5, 8], strides = [1, 1]} : vector<10x32xf32> to vector<5x8xf32>
    %341 = vector.extract_strided_slice %273 {offsets = [5, 0], sizes = [5, 8], strides = [1, 1]} : vector<10x32xf32> to vector<5x8xf32>
    %342 = vector.extract_strided_slice %274 {offsets = [5, 0], sizes = [5, 8], strides = [1, 1]} : vector<10x32xf32> to vector<5x8xf32>
    %cst_110 = arith.constant dense<0.000000e+00> : vector<5x5xf32>
    %343 = tpu.matmul %340, %341, %cst_110 {dimension_numbers = #tpu.dot_dimension_numbers<[1], [1], [0], [0], [0, 0, 1, 0], [], []>} : vector<5x8xf32>, vector<5x8xf32>, vector<5x5xf32> -> vector<5x5xf32>
    %cst_111 = arith.constant 0.353553385 : f32
    %344 = vector.broadcast %cst_111 : f32 to vector<5x5xf32>
    %345 = arith.mulf %343, %344 : vector<5x5xf32>
    %cst_112 = arith.constant dense<0xFF800000> : vector<5xf32>
    %346 = vector.multi_reduction <maximumf>, %345, %cst_112 [1] : vector<5x5xf32> to vector<5xf32>
    %347 = vector.shape_cast %346 : vector<5xf32> to vector<5x1xf32>
    %348 = vector.broadcast %347 : vector<5x1xf32> to vector<5x5xf32>
    %349 = arith.subf %345, %348 : vector<5x5xf32>
    %350 = math.exp %349 : vector<5x5xf32>
    %cst_113 = arith.constant dense<0.000000e+00> : vector<5xf32>
    %351 = vector.multi_reduction <add>, %350, %cst_113 [1] : vector<5x5xf32> to vector<5xf32>
    %352 = vector.shape_cast %351 : vector<5xf32> to vector<5x1xf32>
    %353 = vector.broadcast %352 : vector<5x1xf32> to vector<5x5xf32>
    %354 = arith.divf %350, %353 : vector<5x5xf32>
    %cst_114 = arith.constant dense<0.000000e+00> : vector<5x8xf32>
    %355 = tpu.matmul %354, %342, %cst_114 {dimension_numbers = #tpu.dot_dimension_numbers<[1], [0], [0], [1], [0, 0, 1, 1], [], []>} : vector<5x5xf32>, vector<5x8xf32>, vector<5x8xf32> -> vector<5x8xf32>
    %356 = vector.extract_strided_slice %272 {offsets = [5, 8], sizes = [5, 8], strides = [1, 1]} : vector<10x32xf32> to vector<5x8xf32>
    %357 = vector.extract_strided_slice %273 {offsets = [5, 8], sizes = [5, 8], strides = [1, 1]} : vector<10x32xf32> to vector<5x8xf32>
    %358 = vector.extract_strided_slice %274 {offsets = [5, 8], sizes = [5, 8], strides = [1, 1]} : vector<10x32xf32> to vector<5x8xf32>
    %cst_115 = arith.constant dense<0.000000e+00> : vector<5x5xf32>
    %359 = tpu.matmul %356, %357, %cst_115 {dimension_numbers = #tpu.dot_dimension_numbers<[1], [1], [0], [0], [0, 0, 1, 0], [], []>} : vector<5x8xf32>, vector<5x8xf32>, vector<5x5xf32> -> vector<5x5xf32>
    %cst_116 = arith.constant 0.353553385 : f32
    %360 = vector.broadcast %cst_116 : f32 to vector<5x5xf32>
    %361 = arith.mulf %359, %360 : vector<5x5xf32>
    %cst_117 = arith.constant dense<0xFF800000> : vector<5xf32>
    %362 = vector.multi_reduction <maximumf>, %361, %cst_117 [1] : vector<5x5xf32> to vector<5xf32>
    %363 = vector.shape_cast %362 : vector<5xf32> to vector<5x1xf32>
    %364 = vector.broadcast %363 : vector<5x1xf32> to vector<5x5xf32>
    %365 = arith.subf %361, %364 : vector<5x5xf32>
    %366 = math.exp %365 : vector<5x5xf32>
    %cst_118 = arith.constant dense<0.000000e+00> : vector<5xf32>
    %367 = vector.multi_reduction <add>, %366, %cst_118 [1] : vector<5x5xf32> to vector<5xf32>
    %368 = vector.shape_cast %367 : vector<5xf32> to vector<5x1xf32>
    %369 = vector.broadcast %368 : vector<5x1xf32> to vector<5x5xf32>
    %370 = arith.divf %366, %369 : vector<5x5xf32>
    %cst_119 = arith.constant dense<0.000000e+00> : vector<5x8xf32>
    %371 = tpu.matmul %370, %358, %cst_119 {dimension_numbers = #tpu.dot_dimension_numbers<[1], [0], [0], [1], [0, 0, 1, 1], [], []>} : vector<5x5xf32>, vector<5x8xf32>, vector<5x8xf32> -> vector<5x8xf32>
    %372 = vector.extract_strided_slice %272 {offsets = [5, 16], sizes = [5, 8], strides = [1, 1]} : vector<10x32xf32> to vector<5x8xf32>
    %373 = vector.extract_strided_slice %273 {offsets = [5, 16], sizes = [5, 8], strides = [1, 1]} : vector<10x32xf32> to vector<5x8xf32>
    %374 = vector.extract_strided_slice %274 {offsets = [5, 16], sizes = [5, 8], strides = [1, 1]} : vector<10x32xf32> to vector<5x8xf32>
    %cst_120 = arith.constant dense<0.000000e+00> : vector<5x5xf32>
    %375 = tpu.matmul %372, %373, %cst_120 {dimension_numbers = #tpu.dot_dimension_numbers<[1], [1], [0], [0], [0, 0, 1, 0], [], []>} : vector<5x8xf32>, vector<5x8xf32>, vector<5x5xf32> -> vector<5x5xf32>
    %cst_121 = arith.constant 0.353553385 : f32
    %376 = vector.broadcast %cst_121 : f32 to vector<5x5xf32>
    %377 = arith.mulf %375, %376 : vector<5x5xf32>
    %cst_122 = arith.constant dense<0xFF800000> : vector<5xf32>
    %378 = vector.multi_reduction <maximumf>, %377, %cst_122 [1] : vector<5x5xf32> to vector<5xf32>
    %379 = vector.shape_cast %378 : vector<5xf32> to vector<5x1xf32>
    %380 = vector.broadcast %379 : vector<5x1xf32> to vector<5x5xf32>
    %381 = arith.subf %377, %380 : vector<5x5xf32>
    %382 = math.exp %381 : vector<5x5xf32>
    %cst_123 = arith.constant dense<0.000000e+00> : vector<5xf32>
    %383 = vector.multi_reduction <add>, %382, %cst_123 [1] : vector<5x5xf32> to vector<5xf32>
    %384 = vector.shape_cast %383 : vector<5xf32> to vector<5x1xf32>
    %385 = vector.broadcast %384 : vector<5x1xf32> to vector<5x5xf32>
    %386 = arith.divf %382, %385 : vector<5x5xf32>
    %cst_124 = arith.constant dense<0.000000e+00> : vector<5x8xf32>
    %387 = tpu.matmul %386, %374, %cst_124 {dimension_numbers = #tpu.dot_dimension_numbers<[1], [0], [0], [1], [0, 0, 1, 1], [], []>} : vector<5x5xf32>, vector<5x8xf32>, vector<5x8xf32> -> vector<5x8xf32>
    %388 = vector.extract_strided_slice %272 {offsets = [5, 24], sizes = [5, 8], strides = [1, 1]} : vector<10x32xf32> to vector<5x8xf32>
    %389 = vector.extract_strided_slice %273 {offsets = [5, 24], sizes = [5, 8], strides = [1, 1]} : vector<10x32xf32> to vector<5x8xf32>
    %390 = vector.extract_strided_slice %274 {offsets = [5, 24], sizes = [5, 8], strides = [1, 1]} : vector<10x32xf32> to vector<5x8xf32>
    %cst_125 = arith.constant dense<0.000000e+00> : vector<5x5xf32>
    %391 = tpu.matmul %388, %389, %cst_125 {dimension_numbers = #tpu.dot_dimension_numbers<[1], [1], [0], [0], [0, 0, 1, 0], [], []>} : vector<5x8xf32>, vector<5x8xf32>, vector<5x5xf32> -> vector<5x5xf32>
    %cst_126 = arith.constant 0.353553385 : f32
    %392 = vector.broadcast %cst_126 : f32 to vector<5x5xf32>
    %393 = arith.mulf %391, %392 : vector<5x5xf32>
    %cst_127 = arith.constant dense<0xFF800000> : vector<5xf32>
    %394 = vector.multi_reduction <maximumf>, %393, %cst_127 [1] : vector<5x5xf32> to vector<5xf32>
    %395 = vector.shape_cast %394 : vector<5xf32> to vector<5x1xf32>
    %396 = vector.broadcast %395 : vector<5x1xf32> to vector<5x5xf32>
    %397 = arith.subf %393, %396 : vector<5x5xf32>
    %398 = math.exp %397 : vector<5x5xf32>
    %cst_128 = arith.constant dense<0.000000e+00> : vector<5xf32>
    %399 = vector.multi_reduction <add>, %398, %cst_128 [1] : vector<5x5xf32> to vector<5xf32>
    %400 = vector.shape_cast %399 : vector<5xf32> to vector<5x1xf32>
    %401 = vector.broadcast %400 : vector<5x1xf32> to vector<5x5xf32>
    %402 = arith.divf %398, %401 : vector<5x5xf32>
    %cst_129 = arith.constant dense<0.000000e+00> : vector<5x8xf32>
    %403 = tpu.matmul %402, %390, %cst_129 {dimension_numbers = #tpu.dot_dimension_numbers<[1], [0], [0], [1], [0, 0, 1, 1], [], []>} : vector<5x5xf32>, vector<5x8xf32>, vector<5x8xf32> -> vector<5x8xf32>
    %404 = tpu.concatenate %355, %371, %387, %403 in 1 : vector<5x8xf32>, vector<5x8xf32>, vector<5x8xf32>, vector<5x8xf32> -> vector<5x32xf32>
    %405 = tpu.concatenate %339, %404 in 0 : vector<5x32xf32>, vector<5x32xf32> -> vector<10x32xf32>
    %c1_130 = arith.constant 1 : index
    %c0_131 = arith.constant 0 : index
    %c0_132 = arith.constant 0 : index
    %406 = vector.load %arg5[%c1_130, %c0_131, %c0_132] : memref<2x32x32xf32, #tpu.memory_space<vmem>>, vector<1x32x32xf32>
    %407 = vector.shape_cast %406 : vector<1x32x32xf32> to vector<32x32xf32>
    %cst_133 = arith.constant dense<0.000000e+00> : vector<10x32xf32>
    %408 = tpu.matmul %405, %407, %cst_133 {dimension_numbers = #tpu.dot_dimension_numbers<[1], [0], [0], [1], [0, 0, 1, 1], [], []>} : vector<10x32xf32>, vector<32x32xf32>, vector<10x32xf32> -> vector<10x32xf32>
    %409 = arith.addf %234, %408 : vector<10x32xf32>
    %410 = vector.broadcast %242 : vector<1x32xf32> to vector<10x32xf32>
    %411 = arith.addf %409, %410 : vector<10x32xf32>
    %cst_134 = arith.constant dense<0.000000e+00> : vector<10xf32>
    %412 = vector.multi_reduction <add>, %411, %cst_134 [1] : vector<10x32xf32> to vector<10xf32>
    %413 = vector.shape_cast %412 : vector<10xf32> to vector<10x1xf32>
    %cst_135 = arith.constant 3.200000e+01 : f32
    %414 = vector.broadcast %cst_135 : f32 to vector<10x1xf32>
    %415 = arith.divf %413, %414 : vector<10x1xf32>
    %416 = vector.broadcast %415 : vector<10x1xf32> to vector<10x32xf32>
    %417 = arith.subf %411, %416 : vector<10x32xf32>
    %418 = arith.mulf %417, %417 : vector<10x32xf32>
    %cst_136 = arith.constant dense<0.000000e+00> : vector<10xf32>
    %419 = vector.multi_reduction <add>, %418, %cst_136 [1] : vector<10x32xf32> to vector<10xf32>
    %420 = vector.shape_cast %419 : vector<10xf32> to vector<10x1xf32>
    %cst_137 = arith.constant 3.200000e+01 : f32
    %421 = vector.broadcast %cst_137 : f32 to vector<10x1xf32>
    %422 = arith.divf %420, %421 : vector<10x1xf32>
    %423 = vector.broadcast %415 : vector<10x1xf32> to vector<10x32xf32>
    %424 = arith.subf %411, %423 : vector<10x32xf32>
    %cst_138 = arith.constant 9.99999997E-7 : f32
    %425 = vector.broadcast %cst_138 : f32 to vector<10x1xf32>
    %426 = arith.addf %422, %425 : vector<10x1xf32>
    %427 = math.rsqrt %426 : vector<10x1xf32>
    %428 = vector.broadcast %427 : vector<10x1xf32> to vector<10x32xf32>
    %429 = arith.mulf %424, %428 : vector<10x32xf32>
    %430 = vector.broadcast %239 : vector<1x32xf32> to vector<10x32xf32>
    %431 = arith.mulf %429, %430 : vector<10x32xf32>
    %432 = vector.broadcast %240 : vector<1x32xf32> to vector<10x32xf32>
    %433 = arith.addf %431, %432 : vector<10x32xf32>
    %c1_139 = arith.constant 1 : index
    %c0_140 = arith.constant 0 : index
    %c0_141 = arith.constant 0 : index
    %434 = vector.load %arg6[%c1_139, %c0_140, %c0_141] : memref<2x32x64xf32, #tpu.memory_space<vmem>>, vector<1x32x64xf32>
    %435 = vector.shape_cast %434 : vector<1x32x64xf32> to vector<32x64xf32>
    %cst_142 = arith.constant dense<0.000000e+00> : vector<10x64xf32>
    %436 = tpu.matmul %433, %435, %cst_142 {dimension_numbers = #tpu.dot_dimension_numbers<[1], [0], [0], [1], [0, 0, 1, 1], [], []>} : vector<10x32xf32>, vector<32x64xf32>, vector<10x64xf32> -> vector<10x64xf32>
    %437 = vector.broadcast %243 : vector<1x64xf32> to vector<10x64xf32>
    %438 = arith.addf %436, %437 : vector<10x64xf32>
    %cst_143 = arith.constant 5.000000e-01 : f32
    %439 = vector.broadcast %cst_143 : f32 to vector<10x64xf32>
    %440 = arith.mulf %439, %438 : vector<10x64xf32>
    %cst_144 = arith.constant 0.707106769 : f32
    %441 = vector.broadcast %cst_144 : f32 to vector<10x64xf32>
    %442 = arith.mulf %438, %441 : vector<10x64xf32>
    %443 = math.erf %442 : vector<10x64xf32>
    %cst_145 = arith.constant 1.000000e+00 : f32
    %444 = vector.broadcast %cst_145 : f32 to vector<10x64xf32>
    %445 = arith.addf %444, %443 : vector<10x64xf32>
    %446 = arith.mulf %440, %445 : vector<10x64xf32>
    %c1_146 = arith.constant 1 : index
    %c0_147 = arith.constant 0 : index
    %c0_148 = arith.constant 0 : index
    %447 = vector.load %arg7[%c1_146, %c0_147, %c0_148] : memref<2x64x32xf32, #tpu.memory_space<vmem>>, vector<1x64x32xf32>
    %448 = vector.shape_cast %447 : vector<1x64x32xf32> to vector<64x32xf32>
    %cst_149 = arith.constant dense<0.000000e+00> : vector<10x32xf32>
    %449 = tpu.matmul %446, %448, %cst_149 {dimension_numbers = #tpu.dot_dimension_numbers<[1], [0], [0], [1], [0, 0, 1, 1], [], []>} : vector<10x64xf32>, vector<64x32xf32>, vector<10x32xf32> -> vector<10x32xf32>
    %450 = arith.addf %411, %449 : vector<10x32xf32>
    %451 = vector.broadcast %244 : vector<1x32xf32> to vector<10x32xf32>
    %452 = arith.addf %450, %451 : vector<10x32xf32>
    %453 = vector.extract_strided_slice %0 {offsets = [0, 0], sizes = [1, 32], strides = [1, 1]} : vector<8x128xf32> to vector<1x32xf32>
    %454 = vector.extract_strided_slice %0 {offsets = [1, 0], sizes = [1, 32], strides = [1, 1]} : vector<8x128xf32> to vector<1x32xf32>
    %455 = vector.extract_strided_slice %0 {offsets = [2, 0], sizes = [1, 128], strides = [1, 1]} : vector<8x128xf32> to vector<1x128xf32>
    %456 = vector.extract_strided_slice %452 {offsets = [0, 0], sizes = [1, 32], strides = [1, 1]} : vector<10x32xf32> to vector<1x32xf32>
    %457 = vector.extract_strided_slice %452 {offsets = [5, 0], sizes = [1, 32], strides = [1, 1]} : vector<10x32xf32> to vector<1x32xf32>
    %458 = tpu.concatenate %456, %457 in 0 : vector<1x32xf32>, vector<1x32xf32> -> vector<2x32xf32>
    %cst_150 = arith.constant dense<0.000000e+00> : vector<2xf32>
    %459 = vector.multi_reduction <add>, %458, %cst_150 [1] : vector<2x32xf32> to vector<2xf32>
    %460 = vector.shape_cast %459 : vector<2xf32> to vector<2x1xf32>
    %cst_151 = arith.constant 3.200000e+01 : f32
    %461 = vector.broadcast %cst_151 : f32 to vector<2x1xf32>
    %462 = arith.divf %460, %461 : vector<2x1xf32>
    %463 = vector.broadcast %462 : vector<2x1xf32> to vector<2x32xf32>
    %464 = arith.subf %458, %463 : vector<2x32xf32>
    %465 = arith.mulf %464, %464 : vector<2x32xf32>
    %cst_152 = arith.constant dense<0.000000e+00> : vector<2xf32>
    %466 = vector.multi_reduction <add>, %465, %cst_152 [1] : vector<2x32xf32> to vector<2xf32>
    %467 = vector.shape_cast %466 : vector<2xf32> to vector<2x1xf32>
    %cst_153 = arith.constant 3.200000e+01 : f32
    %468 = vector.broadcast %cst_153 : f32 to vector<2x1xf32>
    %469 = arith.divf %467, %468 : vector<2x1xf32>
    %470 = vector.broadcast %462 : vector<2x1xf32> to vector<2x32xf32>
    %471 = arith.subf %458, %470 : vector<2x32xf32>
    %cst_154 = arith.constant 9.99999997E-7 : f32
    %472 = vector.broadcast %cst_154 : f32 to vector<2x1xf32>
    %473 = arith.addf %469, %472 : vector<2x1xf32>
    %474 = math.rsqrt %473 : vector<2x1xf32>
    %475 = vector.broadcast %474 : vector<2x1xf32> to vector<2x32xf32>
    %476 = arith.mulf %471, %475 : vector<2x32xf32>
    %477 = vector.broadcast %453 : vector<1x32xf32> to vector<2x32xf32>
    %478 = arith.mulf %476, %477 : vector<2x32xf32>
    %479 = vector.broadcast %454 : vector<1x32xf32> to vector<2x32xf32>
    %480 = arith.addf %478, %479 : vector<2x32xf32>
    %c0_155 = arith.constant 0 : index
    %c0_156 = arith.constant 0 : index
    %481 = vector.load %arg9[%c0_155, %c0_156] : memref<32x128xf32, #tpu.memory_space<vmem>>, vector<32x128xf32>
    %cst_157 = arith.constant dense<0.000000e+00> : vector<2x128xf32>
    %482 = tpu.matmul %480, %481, %cst_157 {dimension_numbers = #tpu.dot_dimension_numbers<[1], [0], [0], [1], [0, 0, 1, 1], [], []>} : vector<2x32xf32>, vector<32x128xf32>, vector<2x128xf32> -> vector<2x128xf32>
    %483 = vector.broadcast %455 : vector<1x128xf32> to vector<2x128xf32>
    %484 = arith.addf %482, %483 : vector<2x128xf32>
    %c0_158 = arith.constant 0 : index
    %c0_159 = arith.constant 0 : index
    %485 = vector.load %arg11[%c0_158, %c0_159] : memref<2x128xf32, #tpu.memory_space<vmem>>, vector<2x128xf32>
    tpu.vector_store %arg11[%c0_158, %c0_159], %484 {strides = array<i32>} : memref<2x128xf32, #tpu.memory_space<vmem>>, vector<2x128xf32>,
    return
  }
  func.func @transform_0(%arg0: i32) -> (i32, i32) {
    %c0_i32 = arith.constant 0 : i32
    %c0_i32_0 = arith.constant 0 : i32
    %c0_i32_1 = arith.constant 0 : i32
    return %c0_i32, %c0_i32_0 : i32, i32
  }
  func.func @transform_1(%arg0: i32) -> (i32, i32) {
    %c0_i32 = arith.constant 0 : i32
    %c0_i32_0 = arith.constant 0 : i32
    %c0_i32_1 = arith.constant 0 : i32
    return %c0_i32, %c0_i32_0 : i32, i32
  }
  func.func @transform_2(%arg0: i32) -> (i32, i32) {
    %c0_i32 = arith.constant 0 : i32
    %c0_i32_0 = arith.constant 0 : i32
    %c0_i32_1 = arith.constant 0 : i32
    return %c0_i32, %c0_i32_0 : i32, i32
  }
  func.func @transform_3(%arg0: i32) -> (i32, i32, i32) {
    %c0_i32 = arith.constant 0 : i32
    %c0_i32_0 = arith.constant 0 : i32
    %c0_i32_1 = arith.constant 0 : i32
    %c0_i32_2 = arith.constant 0 : i32
    return %c0_i32, %c0_i32_0, %c0_i32_1 : i32, i32, i32
  }
  func.func @transform_4(%arg0: i32) -> (i32, i32, i32) {
    %c0_i32 = arith.constant 0 : i32
    %c0_i32_0 = arith.constant 0 : i32
    %c0_i32_1 = arith.constant 0 : i32
    %c0_i32_2 = arith.constant 0 : i32
    return %c0_i32, %c0_i32_0, %c0_i32_1 : i32, i32, i32
  }
  func.func @transform_5(%arg0: i32) -> (i32, i32, i32) {
    %c0_i32 = arith.constant 0 : i32
    %c0_i32_0 = arith.constant 0 : i32
    %c0_i32_1 = arith.constant 0 : i32
    %c0_i32_2 = arith.constant 0 : i32
    return %c0_i32, %c0_i32_0, %c0_i32_1 : i32, i32, i32
  }
  func.func @transform_6(%arg0: i32) -> (i32, i32, i32) {
    %c0_i32 = arith.constant 0 : i32
    %c0_i32_0 = arith.constant 0 : i32
    %c0_i32_1 = arith.constant 0 : i32
    %c0_i32_2 = arith.constant 0 : i32
    return %c0_i32, %c0_i32_0, %c0_i32_1 : i32, i32, i32
  }
  func.func @transform_7(%arg0: i32) -> (i32, i32, i32) {
    %c0_i32 = arith.constant 0 : i32
    %c0_i32_0 = arith.constant 0 : i32
    %c0_i32_1 = arith.constant 0 : i32
    %c0_i32_2 = arith.constant 0 : i32
    return %c0_i32, %c0_i32_0, %c0_i32_1 : i32, i32, i32
  }
  func.func @transform_8(%arg0: i32) -> (i32, i32) {
    %c0_i32 = arith.constant 0 : i32
    %c0_i32_0 = arith.constant 0 : i32
    %c0_i32_1 = arith.constant 0 : i32
    return %c0_i32, %c0_i32_0 : i32, i32
  }
  func.func @transform_9(%arg0: i32) -> (i32, i32) {
    %c0_i32 = arith.constant 0 : i32
    %c0_i32_0 = arith.constant 0 : i32
    %c0_i32_1 = arith.constant 0 : i32
    return %c0_i32, %c0_i32_0 : i32, i32
  }
  func.func @transform_10(%arg0: i32) -> (i32, i32) {
    %c0_i32 = arith.constant 0 : i32
    %c0_i32_0 = arith.constant 0 : i32
    %c0_i32_1 = arith.constant 0 : i32
    return %c0_i32, %c0_i32_0 : i32, i32
  }
}

</mosaic_0001>

<bundles_post_ra>
// kernel: tpu_custom_call.1
= control target key start
LH: loop header
LB: loop body
LE: loop exit
PB: predicated region body
PF: predicated region fallthrough
CT: control target
= control target key end

     0   :  { %v4705_v3 = vmov 0.0|0.0   ;;  %vm67_vm0 = vcmask 523264   ;;  %s5532_s0 = inlined_call_operand.vmem [shape: f32[8,192], index: 0, kind: input, shape index: {}]   ;;  %s5533_s1 = inlined_call_operand.vmem [shape: f32[192,32], index: 1, kind: input, shape index: {}]   ;;  %s5534_s2 = inlined_call_operand.vmem [shape: f32[5,32], index: 2, kind: input, shape index: {}]   ;;  %s5535_s3 = inlined_call_operand.vmem [shape: f32[2,32,96], index: 3, kind: input, shape index: {}]   ;;  %s5536_s4 = inlined_call_operand.vmem [shape: f32[2,32,32], index: 4, kind: input, shape index: {}]   ;;  %s5537_s5 = inlined_call_operand.vmem [shape: f32[2,32,64], index: 5, kind: input, shape index: {}]   ;;  %s5538_s6 = inlined_call_operand.vmem [shape: f32[2,64,32], index: 6, kind: input, shape index: {}]   ;;  %s5539_s7 = inlined_call_operand.vmem [shape: f32[2,8,128], index: 7, kind: input, shape index: {}]   ;;  %s5540_s8 = inlined_call_operand.vmem [shape: f32[32,128], index: 8, kind: input, shape index: {}]   ;;  %s5541_s9 = inlined_call_operand.vmem [shape: f32[8,128], index: 9, kind: input, shape index: {}]   ;;  %s5542_s10 = inlined_call_operand.hbm [shape: f32[2,128], index: 10, kind: output, shape index: {}]  }
   0x1   :  { %v39_v0 = vld [vmem:[%s5533_s1] sm:$0xff]  ;;  %v40_v1 = vld [vmem:[%s5533_s1 + $0x8] sm:$0xff]  ;;  %v41_v2 = vld [vmem:[%s5533_s1 + $0x10] sm:$0xff]  ;;  %4450 = vmatprep.subr.bf16.mxu0 %v4705_v3 }
   0x2   :  { %v4451_v4 = vpack.c.bf16 %v40_v1, %v39_v0  ;;  %v42_v5 = vld [vmem:[%s5533_s1 + $0x18] sm:$0xff]  ;;  %v43_v7 = vld [vmem:[%s5533_s1 + $0x20] sm:$0xff]  ;;  %v44_v8 = vld [vmem:[%s5533_s1 + $0x28] sm:$0xff] }
   0x3   :  { %v4454_v6 = vpack.c.bf16 %v42_v5, %v41_v2  ;;  %v4457_v9 = vpack.c.bf16 %v44_v8, %v43_v7  ;;  %v45_v10 = vld [vmem:[%s5533_s1 + $0x30] sm:$0xff]  ;;  %v46_v11 = vld [vmem:[%s5533_s1 + $0x38] sm:$0xff]  ;;  %v38_v12 = vld [vmem:[%s5532_s0 + $0x8] sm:$0xff] }
   0x4   :  { %4452 = vmatpush1.bf16.msra.mxu0 %v4451_v4  ;;  %3947 = vmatprep.mubr.msk.f32.mxu0 %vm67_vm0, %v38_v12 }
   0x5   :  { %4453 = vmatprep.subr.bf16.mxu0 %v4705_v3 }
   0x8   :  { %4455 = vmatpush1.bf16.msra.mxu0 %v4454_v6 }
   0x9   :  { %4456 = vmatprep.subr.bf16.mxu0 %v4705_v3 }
   0xa   :  { %15 = vsyncpa [#allocation3], 0  ;;  %v4460_v13 = vpack.c.bf16 %v46_v11, %v45_v10  ;;  %v47_v14 = vld [vmem:[%s5533_s1 + $0x40] sm:$0xff]  ;;  %v48_v15 = vld [vmem:[%s5533_s1 + $0x48] sm:$0xff]  ;;  %v63_v39 = vlaneseq  ;;  %vm157_vm1 = vcmask 1040384   ;;  %vm159_vm2 = vcmask 1044480  }
   0xb   :  { %v4463_v16 = vpack.c.bf16 %v48_v15, %v47_v14  ;;  %v49_v17 = vld [vmem:[%s5533_s1 + $0x50] sm:$0xff]  ;;  %v50_v18 = vld [vmem:[%s5533_s1 + $0x58] sm:$0xff]  ;;  %v51_v20 = vld [vmem:[%s5533_s1 + $0x60] sm:$0xff]  ;;  %vm161_vm3 = vcmask 1045504   ;;  %vm164_vm4 = vcmask 261120   ;;  %vm168_vm5 = vcmask 254976  }
   0xc   :  { %4458 = vmatpush1.bf16.msra.mxu0 %v4457_v9  ;;  %v4466_v19 = vpack.c.bf16 %v50_v18, %v49_v17  ;;  %v52_v21 = vld [vmem:[%s5533_s1 + $0x68] sm:$0xff]  ;;  %v53_v23 = vld [vmem:[%s5533_s1 + $0x70] sm:$0xff]  ;;  %v54_v24 = vld [vmem:[%s5533_s1 + $0x78] sm:$0xff]  ;;  %v4869_v40 = vshrl.u32 %v63_v39, 7  ;;  %vm4707_vm6 = vmmov 0   ;;  %s4708_s16 = smov 96  }
   0xd   :  { %4459 = vmatprep.subr.bf16.mxu0 %v4705_v3  ;;  %v4469_v22 = vpack.c.bf16 %v52_v21, %v51_v20  ;;  %v4472_v25 = vpack.c.bf16 %v54_v24, %v53_v23  ;;  %v55_v26 = vld [vmem:[%s5533_s1 + $0x80] sm:$0xff]  ;;  %v56_v27 = vld [vmem:[%s5533_s1 + $0x88] sm:$0xff]  ;;  %v57_v29 = vld [vmem:[%s5533_s1 + $0x90] sm:$0xff]  ;;  %s4709_s17 = smov 88   ;;  %vm297_vm7 = vcmask 64512   ;;  %vm373_vm8 = vcmask 36864  }
   0xe   :  { %v4475_v28 = vpack.c.bf16 %v56_v27, %v55_v26  ;;  %v58_v30 = vld [vmem:[%s5533_s1 + $0x98] sm:$0xff]  ;;  %v59_v32 = vld [vmem:[%s5533_s1 + $0xa0] sm:$0xff]  ;;  %v60_v33 = vld [vmem:[%s5533_s1 + $0xa8] sm:$0xff]  ;;  %v4872_v41 = vsub.s32 3, %v4869_v40  ;;  %v4917_v21 = vsub.s32 1, %v4869_v40  ;;  %s4710_s18 = smov 64  }
   0xf   :  { %v4478_v31 = vpack.c.bf16 %v58_v30, %v57_v29  ;;  %v4481_v34 = vpack.c.bf16 %v60_v33, %v59_v32  ;;  %v61_v35 = vld [vmem:[%s5533_s1 + $0xb0] sm:$0xff]  ;;  %v62_v36 = vld [vmem:[%s5533_s1 + $0xb8] sm:$0xff]  ;;  %v37_v38 = vld [vmem:[%s5532_s0] sm:$0xff]  ;;  %v4706_v32 = vmov 0.0   ;;  %v211_v33 = vsub.s32 4, %v4869_v40  ;;  %s4711_s19 = smov 120  }
  0x10   :  { %4461 = vmatpush1.bf16.msra.mxu0 %v4460_v13  ;;  %v4484_v37 = vpack.c.bf16 %v62_v36, %v61_v35  ;;  %v36_v42 = vld [vmem:[%s5541_s9] sm:$0xff]  ;;  %v206_v8 = vld [vmem:[%s5535_s3 + $0x8] sm:$0xff]  ;;  %v207_v9 = vld [vmem:[%s5535_s3 + $0x10] sm:$0xff]  ;;  %vm387_vm9 = vcmask 39936   ;;  %s4712_s20 = smov 56   ;;  %s4713_s21 = smov 112  }
  0x11   :  { %4462 = vmatprep.subr.bf16.mxu0 %v4705_v3  ;;  %v141_v43 = vld [vmem:[%s5534_s2] sm:$0x1f]  ;;  %v66_v44 = vrot.slane %v36_v42, %v4872_v41  ;;  %v208_v11 = vld [vmem:[%s5535_s3 + $0x18] sm:$0xff]  ;;  %s4714_s22 = smov 80   ;;  %s4715_s23 = smov 72   ;;  %vm982_vm10 = vcmask 1042432  }
  0x12   :  { %v143_v45 = vrot.slane %v141_v43, 1  ;;  %v146_v46 = vrot.slane %v141_v43, 5  ;;  %v152_v52 = vrot.slane %v141_v43, 3  ;;  %v205_v7 = vld [vmem:[%s5535_s3] sm:$0xff]  ;;  %v4490_v12 = vpack.c.bf16 %v208_v11, %v207_v9  ;;  %s4716_s24 = smov 104   ;;  %s4717_s25 = smov 48  }
  0x13   :  { %v4486_v10 = vpack.c.bf16 %v206_v8, %v205_v7  ;;  %v4914_v20 = vld [vmem:[%s5539_s7] sm:$0xff]  ;;  %s4718_s26 = smov 40   ;;  %s4719_s1 = smov 8   ;;  %vm979_vm11 = vcmask 195584   ;;  %vm977_vm12 = vcmask 130048  }
  0x14   :  { %4464 = vmatpush1.bf16.msra.mxu0 %v4463_v16  ;;  %s4720_s27 = smov 16   ;;  %s4721_s14 = smov 24  }
  0x15   :  { %4465 = vmatprep.subr.bf16.mxu0 %v4705_v3  ;;  %4487 = vmatprep.subr.bf16.mxu1 %v4486_v10 }
  0x16   :  { %4489 = vmatpush3.bf16.msra.mxu1 %v4486_v10 }
  0x17   :  { %4491 = vmatprep.subr.bf16.mxu1 %v4490_v12 }
  0x18   :  { %4467 = vmatpush1.bf16.msra.mxu0 %v4466_v19  ;;  %v4909_v19 = vsub.s32 0, %v4869_v40 }
  0x19   :  { %4468 = vmatprep.subr.bf16.mxu0 %v4705_v3 }
  0x1a   :  { %4493 = vmatpush3.bf16.msra.mxu1 %v4490_v12 }
  0x1b   :  { %4186 = vmatprep.subr.mxu1 %v4706_v32 }
  0x1c   :  { %4470 = vmatpush1.bf16.msra.mxu0 %v4469_v22  ;;  %v196_v22 = vrot.slane %v4914_v20, %v4909_v19 }
  0x1d   :  { %4471 = vmatprep.subr.bf16.mxu0 %v4705_v3 }
  0x20   :  { %4473 = vmatpush1.bf16.msra.mxu0 %v4472_v25  ;;  %v202_v25 = vrot.slane %v4914_v20, %v4917_v21 }
  0x21   :  { %4474 = vmatprep.subr.bf16.mxu0 %v4705_v3 }
  0x24   :  { %4476 = vmatpush1.bf16.msra.mxu0 %v4475_v28 }
  0x25   :  { %4477 = vmatprep.subr.bf16.mxu0 %v4705_v3 }
  0x28   :  { %4479 = vmatpush1.bf16.msra.mxu0 %v4478_v31 }
  0x29   :  { %4480 = vmatprep.subr.bf16.mxu0 %v4705_v3 }
  0x2c   :  { %4482 = vmatpush1.bf16.msra.mxu0 %v4481_v34  ;;  %v212_v34 = vrot.slane %v4914_v20, %v211_v33 }
  0x2d   :  { %4483 = vmatprep.subr.bf16.mxu0 %v4705_v3 }
  0x30   :  { %4485 = vmatpush1.bf16.msra.mxu0 %v4484_v37 }
  0x31   :  { %4246 = vmatprep.subr.mxu0 %v4706_v32 }
  0x33   :  { %136 = vmatmul.mubr.f32.vlgmr.msra.gmra.mrb[0].mxu0 %v37_v38 }
  0x34   :  { %4248 = vmatprep.mubr.msk.f32.mxu0 %vm4707_vm6, %v4706_v32 }
 0x106   :  { %v137_v47 = vpop.f32.mrb[0].mxu0 }
 0x107   :  { %v138_v48 = vadd.f32 %v137_v47, %v66_v44  ;;  %v139_v49 = vpop.f32.mrb[1].mxu0 }
 0x109   :  { %v145_v50 = vadd.f32 %v143_v45, %v138_v48  ;;  %v148_v51 = vadd.f32 %v146_v46, %v138_v48 }
 0x10b   :  { %v150_v53 = vrot.slane %v145_v50, 7  ;;  %v4881_v54 = vrot.slane %v148_v51, 6 }
 0x10d   :  { %v158_v55 = vsel %vm157_vm1, %v141_v43, %v150_v53  ;;  %v169_v59 = vsel %vm168_vm5, %v4881_v54, 0.0 }
 0x10e   :  { %v160_v56 = vsel %vm159_vm2, %v158_v55, %v152_v52 }
 0x10f   :  { %v4886_v57 = vsel %vm161_vm3, %v160_v56, %v4881_v54 }
 0x110   :  { %v165_v58 = vsel %vm164_vm4, %v4886_v57, 0.0 }
 0x111   :  { %166 = vadd.xlane.f32.xlu0 %v165_v58 }
 0x115   :  { %170 = vadd.xlane.f32.xlu0 %v169_v59 }
 0x19e   :  { %v167_v60 = vpop.xlane.xlu0 %166 }
 0x19f   :  { %v173_v61 = vmul.f32 0.03125, %v167_v60 }
 0x1a1   :  { %v175_v62 = vsub.f32 %v4886_v57, %v173_v61 }
 0x1a2   :  { %v171_v63 = vpop.xlane.xlu0 %170 }
 0x1a3   :  { %v174_v0 = vmul.f32 0.03125, %v171_v63  ;;  %v177_v1 = vmul.f32 %v175_v62, %v175_v62 }
 0x1a5   :  { %v176_v2 = vsub.f32 %v4881_v54, %v174_v0  ;;  %v179_v4 = vsel %vm164_vm4, %v177_v1, 0.0 }
 0x1a6   :  { %180 = vadd.xlane.f32.xlu1 %v179_v4 }
 0x1a7   :  { %v178_v5 = vmul.f32 %v176_v2, %v176_v2 }
 0x1a9   :  { %v182_v6 = vsel %vm168_vm5, %v178_v5, 0.0 }
 0x1aa   :  { %183 = vadd.xlane.f32.xlu1 %v182_v6 }
 0x233   :  { %v181_v13 = vpop.xlane.xlu1 %180 }
 0x234   :  { %v185_v14 = vmul.f32 0.03125, %v181_v13 }
 0x236   :  { %v187_v15 = vadd.f32 1e-06, %v185_v14 }
 0x237   :  { %v184_v16 = vpop.xlane.xlu1 %183 }
 0x238   :  { %4590 = vrsqrt.f32 %v187_v15  ;;  %v186_v17 = vmul.f32 0.03125, %v184_v16 }
 0x23a   :  { %v188_v18 = vadd.f32 1e-06, %v186_v17 }
 0x23c   :  { %4592 = vrsqrt.f32 %v188_v18 }
 0x242   :  { %v4591_v23 = vpop.eup %4590 }
 0x243   :  { %v191_v24 = vmul.f32 %v4591_v23, %v175_v62 }
 0x245   :  { %v197_v26 = vmul.f32 %v196_v22, %v191_v24 }
 0x246   :  { %v4593_v27 = vpop.eup %4592 }
 0x247   :  { %v192_v28 = vmul.f32 %v4593_v27, %v176_v2  ;;  %v203_v29 = vadd.f32 %v202_v25, %v197_v26 }
 0x249   :  { %v198_v30 = vmul.f32 %v196_v22, %v192_v28  ;;  %4183 = vmatprep.mubr.msk.f32.mxu1 %vm164_vm4, %v203_v29 }
 0x24b   :  { %v204_v31 = vadd.f32 %v202_v25, %v198_v30 }
 0x24d   :  { %4184 = vmatmul.mubr.msk.f32.vlgmr.msra.gmra.mrb[0].mxu1 %vm164_vm4, %v204_v31 }
 0x24e   :  { %4188 = vmatprep.mubr.msk.f32.mxu1 %vm4707_vm6, %v4706_v32 }
 0x320   :  { %v4185_v35 = vpop.f32.mrb[0].mxu1 }
 0x321   :  { %v4935_v36 = vadd.f32 %v4185_v35, %v212_v34  ;;  %v285_v37 = vpop.f32.mrb[1].mxu1 }
 0x322   :  { %v4937_v38 = vadd.f32 %v285_v37, %v212_v34 }
 0x324   :  { %295 = vrot.lane.b32.xlu0 %v4937_v38, %s4708_s16 }
 0x328   :  { %465 = vrot.lane.b32.xlu0 %v4937_v38, %s4709_s17 }
 0x396   :  { %v296_v39 = vpop.permute.xlu0 %295 }
 0x397   :  { %4187 = vmatpush3.xpose.msk.msra.mxu1 %vm297_vm7, %v296_v39 }
 0x398   :  { %4191 = vmatprep.subr.mxu1 %v4706_v32 }
 0x39a   :  { %4189 = vmatmul.mubr.msk.f32.vlgmr.msra.gmra.mrb[2].mxu1 %vm297_vm7, %v4937_v38  ;;  %v466_v56 = vpop.permute.xlu0 %465 }
 0x39b   :  { %4193 = vmatprep.mubr.msk.f32.mxu1 %vm4707_vm6, %v4706_v32 }
 0x46d   :  { %v368_v42 = vpop.f32.mrb[2].mxu1 }
 0x46e   :  { %v372_v43 = vmul.f32 0.35355338, %v368_v42  ;;  %v4190_v44 = vpop.f32.mrb[3].mxu1 }
 0x470   :  { %v374_v45 = vsel %vm373_vm8, %v372_v43, -inf }
 0x471   :  { %375 = vmax.xlane.f32.xlu1 %v374_v45 }
 0x482   :  { %385 = vrot.lane.b32.xlu1 %v4937_v38, %s4710_s18 }
 0x4fe   :  { %v376_v46 = vpop.xlane.xlu1 %375 }
 0x4ff   :  { %v377_v47 = vsub.f32 %v372_v43, %v376_v46 }
 0x501   :  { %v378_v48 = vmul.f32 1.442695, %v377_v47 }
 0x502   :  { %v386_v49 = vpop.permute.xlu1 %385 }
 0x503   :  { %4594 = vpow2.f32 %v378_v48  ;;  %4192 = vmatpush3.msk.msra.mxu1 %vm159_vm2, %v386_v49 }
 0x504   :  { %4196 = vmatprep.subr.mxu1 %v4706_v32 }
 0x50d   :  { %v4595_v50 = vpop.eup %4594 }
 0x50e   :  { %v380_v51 = vsel %vm373_vm8, %v4595_v50, 0.0 }
 0x50f   :  { %381 = vadd.xlane.f32.xlu1 %v380_v51  ;;  %v984_v51 = vrot.slane %v4935_v36, 5 }
 0x520   :  { %463 = vrot.lane.b32.xlu1 %v4937_v38, %s4711_s19 }
 0x59c   :  { %v382_v52 = vpop.xlane.xlu1 %381 }
 0x59d   :  { %4596 = vrcp.f32 %v382_v52  ;;  %v983_v52 = vrot.slane %v4937_v38, 5 }
 0x5a0   :  { %v464_v58 = vpop.permute.xlu1 %463 }
 0x5a7   :  { %v4597_v53 = vpop.eup %4596 }
 0x5a8   :  { %v384_v55 = vmul.f32 %v4597_v53, %v4595_v50  ;;  %v5016_v53 = vsel %vm982_vm10, %v983_v52, %v984_v51 }
 0x5aa   :  { %4194 = vmatmul.mubr.msk.f32.vlgmr.msra.gmra.mrb[4].mxu1 %vm387_vm9, %v384_v55 }
 0x5ab   :  { %4197 = vmatpush3.xpose.msk.msra.mxu1 %vm297_vm7, %v466_v56  ;;  %4198 = vmatprep.mubr.msk.f32.mxu1 %vm4707_vm6, %v4706_v32 }
 0x5ac   :  { %4201 = vmatprep.subr.mxu1 %v4706_v32 }
 0x5ae   :  { %4199 = vmatmul.mubr.msk.f32.vlgmr.msra.gmra.mrb[6].mxu1 %vm297_vm7, %v464_v58 }
 0x5af   :  { %4203 = vmatprep.mubr.msk.f32.mxu1 %vm4707_vm6, %v4706_v32 }
 0x67d   :  { %v4965_v59 = vpop.f32.mrb[4].mxu1 }
 0x67e   :  { %v4195_v60 = vpop.f32.mrb[5].mxu1 }
 0x681   :  { %v537_v61 = vpop.f32.mrb[6].mxu1 }
 0x682   :  { %v541_v62 = vmul.f32 0.35355338, %v537_v61  ;;  %v4200_v63 = vpop.f32.mrb[7].mxu1 }
 0x684   :  { %v542_v0 = vsel %vm373_vm8, %v541_v62, -inf }
 0x685   :  { %543 = vmax.xlane.f32.xlu0 %v542_v0 }
 0x69b   :  { %553 = vrot.lane.b32.xlu0 %v4937_v38, %s4712_s20 }
 0x69f   :  { %630 = vrot.lane.b32.xlu0 %v4937_v38, %s4713_s21 }
 0x712   :  { %v544_v1 = vpop.xlane.xlu0 %543 }
 0x713   :  { %v545_v2 = vsub.f32 %v541_v62, %v544_v1 }
 0x715   :  { %v546_v4 = vmul.f32 1.442695, %v545_v2 }
 0x716   :  { %v554_v5 = vpop.permute.xlu0 %553 }
 0x717   :  { %4598 = vpow2.f32 %v546_v4  ;;  %4202 = vmatpush3.msk.msra.mxu1 %vm159_vm2, %v554_v5 }
 0x718   :  { %4206 = vmatprep.subr.mxu1 %v4706_v32 }
 0x71a   :  { %v631_v12 = vpop.permute.xlu0 %630 }
 0x721   :  { %v4599_v6 = vpop.eup %4598 }
 0x722   :  { %v548_v7 = vsel %vm373_vm8, %v4599_v6, 0.0 }
 0x723   :  { %549 = vadd.xlane.f32.xlu1 %v548_v7 }
 0x734   :  { %632 = vrot.lane.b32.xlu1 %v4937_v38, %s4714_s22 }
 0x7b0   :  { %v550_v8 = vpop.xlane.xlu1 %549 }
 0x7b1   :  { %4600 = vrcp.f32 %v550_v8 }
 0x7b4   :  { %v633_v11 = vpop.permute.xlu1 %632 }
 0x7bb   :  { %v4601_v9 = vpop.eup %4600 }
 0x7bc   :  { %v552_v10 = vmul.f32 %v4601_v9, %v4599_v6 }
 0x7be   :  { %4204 = vmatmul.mubr.msk.f32.vlgmr.msra.gmra.mrb[8].mxu1 %vm387_vm9, %v552_v10 }
 0x7bf   :  { %4207 = vmatpush3.xpose.msk.msra.mxu1 %vm297_vm7, %v633_v11  ;;  %4208 = vmatprep.mubr.msk.f32.mxu1 %vm4707_vm6, %v4706_v32 }
 0x7c0   :  { %4211 = vmatprep.subr.mxu1 %v4706_v32 }
 0x7c2   :  { %4209 = vmatmul.mubr.msk.f32.vlgmr.msra.gmra.mrb[10].mxu1 %vm297_vm7, %v631_v12 }
 0x7c3   :  { %4213 = vmatprep.mubr.msk.f32.mxu1 %vm4707_vm6, %v4706_v32 }
 0x891   :  { %v4985_v13 = vpop.f32.mrb[8].mxu1 }
 0x892   :  { %v4205_v14 = vpop.f32.mrb[9].mxu1 }
 0x895   :  { %v704_v15 = vpop.f32.mrb[10].mxu1 }
 0x896   :  { %v708_v16 = vmul.f32 0.35355338, %v704_v15  ;;  %v4210_v17 = vpop.f32.mrb[11].mxu1 }
 0x898   :  { %v709_v18 = vsel %vm373_vm8, %v708_v16, -inf }
 0x899   :  { %710 = vmax.xlane.f32.xlu1 %v709_v18 }
 0x8aa   :  { %799 = vrot.lane.b32.xlu1 %v4937_v38, %s4715_s23 }
 0x8ae   :  { %797 = vrot.lane.b32.xlu1 %v4937_v38, %s4716_s24 }
 0x926   :  { %v711_v22 = vpop.xlane.xlu1 %710 }
 0x927   :  { %v712_v23 = vsub.f32 %v708_v16, %v711_v22 }
 0x929   :  { %v713_v24 = vmul.f32 1.442695, %v712_v23 }
 0x92a   :  { %v800_v30 = vpop.permute.xlu1 %799 }
 0x92b   :  { %4602 = vpow2.f32 %v713_v24 }
 0x92e   :  { %v798_v34 = vpop.permute.xlu1 %797 }
 0x935   :  { %v4603_v25 = vpop.eup %4602 }
 0x936   :  { %v715_v26 = vsel %vm373_vm8, %v4603_v25, 0.0 }
 0x937   :  { %716 = vadd.xlane.f32.xlu0 %v715_v26 }
 0x94d   :  { %720 = vrot.lane.b32.xlu0 %v4937_v38, %s4717_s25 }
 0x9c4   :  { %v717_v27 = vpop.xlane.xlu0 %716 }
 0x9c5   :  { %4604 = vrcp.f32 %v717_v27 }
 0x9c8   :  { %v721_v28 = vpop.permute.xlu0 %720 }
 0x9c9   :  { %4212 = vmatpush3.msk.msra.mxu1 %vm159_vm2, %v721_v28 }
 0x9ca   :  { %4216 = vmatprep.subr.mxu1 %v4706_v32 }
 0x9cf   :  { %v4605_v29 = vpop.eup %4604 }
 0x9d0   :  { %v719_v31 = vmul.f32 %v4605_v29, %v4603_v25 }
 0x9d2   :  { %4214 = vmatmul.mubr.msk.f32.vlgmr.msra.gmra.mrb[12].mxu1 %vm387_vm9, %v719_v31 }
 0x9d3   :  { %4217 = vmatpush3.xpose.msk.msra.mxu1 %vm297_vm7, %v800_v30  ;;  %4218 = vmatprep.mubr.msk.f32.mxu1 %vm4707_vm6, %v4706_v32 }
 0x9d4   :  { %4221 = vmatprep.subr.mxu1 %v4706_v32 }
 0x9d6   :  { %4219 = vmatmul.mubr.msk.f32.vlgmr.msra.gmra.mrb[14].mxu1 %vm297_vm7, %v798_v34 }
 0x9d7   :  { %4223 = vmatprep.mubr.msk.f32.mxu1 %vm4707_vm6, %v4706_v32 }
 0xaa5   :  { %v5005_v35 = vpop.f32.mrb[12].mxu1 }
 0xaa6   :  { %v4215_v37 = vpop.f32.mrb[13].mxu1 }
 0xaa9   :  { %v871_v39 = vpop.f32.mrb[14].mxu1 }
 0xaaa   :  { %v875_v42 = vmul.f32 0.35355338, %v871_v39  ;;  %v4220_v43 = vpop.f32.mrb[15].mxu1 }
 0xaac   :  { %v876_v44 = vsel %vm373_vm8, %v875_v42, -inf }
 0xaad   :  { %877 = vmax.xlane.f32.xlu0 %v876_v44 }
 0xac3   :  { %887 = vrot.lane.b32.xlu0 %v4937_v38, %s4718_s26 }
 0xb3a   :  { %v878_v45 = vpop.xlane.xlu0 %877 }
 0xb3b   :  { %v879_v46 = vsub.f32 %v875_v42, %v878_v45 }
 0xb3d   :  { %v880_v47 = vmul.f32 1.442695, %v879_v46 }
 0xb3e   :  { %v888_v48 = vpop.permute.xlu0 %887 }
 0xb3f   :  { %4606 = vpow2.f32 %v880_v47  ;;  %4222 = vmatpush3.msk.msra.mxu1 %vm159_vm2, %v888_v48 }
 0xb40   :  { %4226 = vmatprep.subr.mxu1 %v4706_v32 }
 0xb49   :  { %v4607_v49 = vpop.eup %4606 }
 0xb4a   :  { %v882_v50 = vsel %vm373_vm8, %v4607_v49, 0.0 }
 0xb4b   :  { %883 = vadd.xlane.f32.xlu1 %v882_v50 }
 0xb5c   :  { %986 = vrot.lane.b32.xlu1 %v5016_v53, %s4708_s16 }
 0xb60   :  { %1153 = vrot.lane.b32.xlu1 %v5016_v53, %s4709_s17 }
 0xb64   :  { %1320 = vrot.lane.b32.xlu1 %v5016_v53, %s4714_s22 }
 0xbd8   :  { %v884_v55 = vpop.xlane.xlu1 %883 }
 0xbd9   :  { %4608 = vrcp.f32 %v884_v55 }
 0xbdc   :  { %v987_v56 = vpop.permute.xlu1 %986 }
 0xbe0   :  { %v1154_v58 = vpop.permute.xlu1 %1153 }
 0xbe3   :  { %v4609_v36 = vpop.eup %4608 }
 0xbe4   :  { %v886_v60 = vmul.f32 %v4609_v36, %v4607_v49  ;;  %v1321_v38 = vpop.permute.xlu1 %1320 }
 0xbe5   :  { %4247 = vmatpush3.xpose.msk.msra.mxu0 %vm297_vm7, %v1321_v38 }
 0xbe6   :  { %4224 = vmatmul.mubr.msk.f32.vlgmr.msra.gmra.mrb[16].mxu1 %vm387_vm9, %v886_v60  ;;  %4256 = vmatprep.subr.mxu0 %v4706_v32 }
 0xbe7   :  { %4227 = vmatpush3.xpose.msk.msra.mxu1 %vm297_vm7, %v987_v56  ;;  %4228 = vmatprep.mubr.msk.f32.mxu1 %vm4707_vm6, %v4706_v32 }
 0xbe8   :  { %4231 = vmatprep.subr.mxu1 %v4706_v32 }
 0xbea   :  { %4229 = vmatmul.mubr.msk.f32.vlgmr.msra.gmra.mrb[18].mxu1 %vm297_vm7, %v5016_v53 }
 0xbeb   :  { %4233 = vmatprep.mubr.msk.f32.mxu1 %vm4707_vm6, %v4706_v32 }
 0xcb9   :  { %v5035_v61 = vpop.f32.mrb[16].mxu1 }
 0xcba   :  { %v4225_v62 = vpop.f32.mrb[17].mxu1 }
 0xcbd   :  { %v1058_v63 = vpop.f32.mrb[18].mxu1 }
 0xcbe   :  { %v1062_v0 = vmul.f32 0.35355338, %v1058_v63  ;;  %v4230_v1 = vpop.f32.mrb[19].mxu1 }
 0xcc0   :  { %v1063_v2 = vsel %vm373_vm8, %v1062_v0, -inf }
 0xcc1   :  { %1064 = vmax.xlane.f32.xlu0 %v1063_v2 }
 0xcd7   :  { %1074 = vrot.lane.b32.xlu0 %v5016_v53, %s4710_s18 }
 0xcdb   :  { %1151 = vrot.lane.b32.xlu0 %v5016_v53, %s4711_s19 }
 0xcdf   :  { %1318 = vrot.lane.b32.xlu0 %v5016_v53, %s4713_s21 }
 0xce3   :  { %1485 = vrot.lane.b32.xlu0 %v5016_v53, %s4716_s24 }
 0xd4e   :  { %v1065_v4 = vpop.xlane.xlu0 %1064 }
 0xd4f   :  { %v1066_v5 = vsub.f32 %v1062_v0, %v1065_v4 }
 0xd51   :  { %v1067_v6 = vmul.f32 1.442695, %v1066_v5 }
 0xd52   :  { %v1075_v7 = vpop.permute.xlu0 %1074 }
 0xd53   :  { %4610 = vpow2.f32 %v1067_v6  ;;  %4232 = vmatpush3.msk.msra.mxu1 %vm159_vm2, %v1075_v7  ;;  %v1671_v6 = vld [vmem:[%s5536_s4] sm:$0xff]  ;;  %v1672_v7 = vld [vmem:[%s5536_s4 + $0x8] sm:$0xff] }
 0xd54   :  { %4236 = vmatprep.subr.mxu1 %v4706_v32 }
 0xd56   :  { %v1152_v8 = vpop.permute.xlu0 %1151 }
 0xd5a   :  { %v1319_v9 = vpop.permute.xlu0 %1318 }
 0xd5b   :  { %4249 = vmatmul.mubr.msk.f32.vlgmr.msra.gmra.mrb[2].mxu0 %vm297_vm7, %v1319_v9  ;;  %v1673_v9 = vld [vmem:[%s5536_s4 + $0x10] sm:$0xff] }
 0xd5c   :  { %4258 = vmatprep.mubr.msk.f32.mxu0 %vm4707_vm6, %v4706_v32 }
 0xd5d   :  { %v4611_v10 = vpop.eup %4610 }
 0xd5e   :  { %v1069_v11 = vsel %vm373_vm8, %v4611_v10, 0.0  ;;  %v1486_v15 = vpop.permute.xlu0 %1485 }
 0xd5f   :  { %1070 = vadd.xlane.f32.xlu1 %v1069_v11 }
 0xd70   :  { %1487 = vrot.lane.b32.xlu1 %v5016_v53, %s4715_s23 }
 0xdec   :  { %v1071_v12 = vpop.xlane.xlu1 %1070 }
 0xded   :  { %4612 = vrcp.f32 %v1071_v12 }
 0xdf0   :  { %v1488_v14 = vpop.permute.xlu1 %1487 }
 0xdf1   :  { %4257 = vmatpush3.xpose.msk.msra.mxu0 %vm297_vm7, %v1488_v14 }
 0xdf4   :  { %4259 = vmatmul.mubr.msk.f32.vlgmr.msra.gmra.mrb[4].mxu0 %vm297_vm7, %v1486_v15 }
 0xdf7   :  { %v4613_v16 = vpop.eup %4612 }
 0xdf8   :  { %v1073_v17 = vmul.f32 %v4613_v16, %v4611_v10  ;;  %v1674_v10 = vld [vmem:[%s5536_s4 + $0x18] sm:$0xff] }
 0xdf9   :  { %v4498_v11 = vpack.c.bf16 %v1674_v10, %v1673_v9 }
 0xdfa   :  { %4234 = vmatmul.mubr.msk.f32.vlgmr.msra.gmra.mrb[20].mxu1 %vm387_vm9, %v1073_v17 }
 0xdfb   :  { %4237 = vmatpush3.xpose.msk.msra.mxu1 %vm297_vm7, %v1154_v58  ;;  %4238 = vmatprep.mubr.msk.f32.mxu1 %vm4707_vm6, %v4706_v32 }
 0xdfc   :  { %4241 = vmatprep.subr.mxu1 %v4706_v32 }
 0xdfe   :  { %4239 = vmatmul.mubr.msk.f32.vlgmr.msra.gmra.mrb[22].mxu1 %vm297_vm7, %v1152_v8  ;;  %v4494_v8 = vpack.c.bf16 %v1672_v7, %v1671_v6 }
 0xdff   :  { %4243 = vmatprep.mubr.msk.f32.mxu1 %vm4707_vm6, %v4706_v32 }
 0xe00   :  { %4495 = vmatprep.subr.bf16.mxu0 %v4494_v8 }
 0xe01   :  { %4497 = vmatpush3.bf16.msra.mxu0 %v4494_v8  ;;  %v5153_v8 = vsub.s32 2, %v4869_v40 }
 0xe02   :  { %4499 = vmatprep.subr.bf16.mxu0 %v4498_v11 }
 0xe03   :  { %v1792_v9 = vrot.slane %v4914_v20, %v5153_v8 }
 0xe05   :  { %4501 = vmatpush3.bf16.msra.mxu0 %v4498_v11 }
 0xe2e   :  { %v1392_v18 = vpop.f32.mrb[2].mxu0 }
 0xe2f   :  { %v1396_v22 = vmul.f32 0.35355338, %v1392_v18  ;;  %v4250_v23 = vpop.f32.mrb[3].mxu0 }
 0xe31   :  { %v1397_v24 = vsel %vm373_vm8, %v1396_v22, -inf }
 0xe32   :  { %1398 = vmax.xlane.f32.xlu0 %v1397_v24 }
 0xebf   :  { %v1399_v25 = vpop.xlane.xlu0 %1398 }
 0xec0   :  { %v1400_v26 = vsub.f32 %v1396_v22, %v1399_v25 }
 0xec2   :  { %v1401_v27 = vmul.f32 1.442695, %v1400_v26 }
 0xec4   :  { %4614 = vpow2.f32 %v1401_v27 }
 0xec7   :  { %v1559_v28 = vpop.f32.mrb[4].mxu0 }
 0xec8   :  { %v1563_v29 = vmul.f32 0.35355338, %v1559_v28  ;;  %v4260_v30 = vpop.f32.mrb[5].mxu0 }
 0xeca   :  { %v1564_v31 = vsel %vm373_vm8, %v1563_v29, -inf }
 0xecb   :  { %1565 = vmax.xlane.f32.xlu0 %v1564_v31 }
 0xecd   :  { %v5066_v34 = vpop.f32.mrb[20].mxu1 }
 0xece   :  { %v4235_v37 = vpop.f32.mrb[21].mxu1  ;;  %v4615_v45 = vpop.eup %4614 }
 0xecf   :  { %v1403_v46 = vsel %vm373_vm8, %v4615_v45, 0.0 }
 0xed1   :  { %v1225_v39 = vpop.f32.mrb[22].mxu1 }
 0xed2   :  { %v1229_v42 = vmul.f32 0.35355338, %v1225_v39  ;;  %v4240_v43 = vpop.f32.mrb[23].mxu1 }
 0xed4   :  { %v1230_v44 = vsel %vm373_vm8, %v1229_v42, -inf }
 0xed5   :  { %1231 = vmax.xlane.f32.xlu1 %v1230_v44 }
 0xed9   :  { %1404 = vadd.xlane.f32.xlu1 %v1403_v46 }
 0xeea   :  { %1241 = vrot.lane.b32.xlu1 %v5016_v53, %s4712_s20 }
 0xeee   :  { %1575 = vrot.lane.b32.xlu1 %v5016_v53, %s4718_s26 }
 0xf58   :  { %v1566_v47 = vpop.xlane.xlu0 %1565 }
 0xf59   :  { %v1567_v48 = vsub.f32 %v1563_v29, %v1566_v47 }
 0xf5b   :  { %v1568_v49 = vmul.f32 1.442695, %v1567_v48 }
 0xf5d   :  { %4616 = vpow2.f32 %v1568_v49 }
 0xf62   :  { %v1232_v50 = vpop.xlane.xlu1 %1231 }
 0xf63   :  { %v1233_v51 = vsub.f32 %v1229_v42, %v1232_v50 }
 0xf65   :  { %v1234_v52 = vmul.f32 1.442695, %v1233_v51 }
 0xf66   :  { %v1405_v55 = vpop.xlane.xlu1 %1404 }
 0xf67   :  { %v4617_v56 = vpop.eup %4616  ;;  %4618 = vpow2.f32 %v1234_v52 }
 0xf68   :  { %v1570_v58 = vsel %vm373_vm8, %v4617_v56, 0.0 }
 0xf69   :  { %1571 = vadd.xlane.f32.xlu0 %v1570_v58 }
 0xf6a   :  { %v1242_v36 = vpop.permute.xlu1 %1241 }
 0xf6b   :  { %4242 = vmatpush3.msk.msra.mxu1 %vm159_vm2, %v1242_v36 }
 0xf6c   :  { %4251 = vmatprep.subr.mxu1 %v4706_v32 }
 0xf71   :  { %v4619_v60 = vpop.eup %4618 }
 0xf72   :  { %v1236_v38 = vsel %vm373_vm8, %v4619_v60, 0.0 }
 0xf73   :  { %1237 = vadd.xlane.f32.xlu0 %v1236_v38 }
 0xf89   :  { %1408 = vrot.lane.b32.xlu0 %v5016_v53, %s4717_s25  ;;  %v1576_v53 = vpop.permute.xlu1 %1575 }
 0xf8d   :  { %965 = vrot.lane.b32.xlu0 %v4985_v13, %s4719_s1 }
 0xf91   :  { %969 = vrot.lane.b32.xlu0 %v5005_v35, %s4720_s27 }
 0xff6   :  { %v1572_v62 = vpop.xlane.xlu0 %1571 }
0x1000   :  { %v1238_v63 = vpop.xlane.xlu0 %1237 }
0x1001   :  { %4620 = vrcp.f32 %v1238_v63  ;;  %v1802_v63 = vld [vmem:[%s5537_s5 + $0x8] sm:$0xff] }
0x1002   :  { %4622 = vrcp.f32 %v1405_v55 }
0x1003   :  { %4624 = vrcp.f32 %v1572_v62  ;;  %v1801_v62 = vld [vmem:[%s5537_s5] sm:$0xff] }
0x1004   :  { %v1409_v4 = vpop.permute.xlu0 %1408 }
0x1008   :  { %v966_v23 = vpop.permute.xlu0 %965 }
0x1009   :  { %v976_v30 = vsel %vm297_vm7, %v4965_v59, %v966_v23  ;;  %v1900_v23 = vld [vmem:[%s5538_s6] sm:$0xff] }
0x100b   :  { %v4621_v0 = vpop.eup %4620 }
0x100c   :  { %v1240_v1 = vmul.f32 %v4621_v0, %v4619_v60  ;;  %v4623_v2 = vpop.eup %4622  ;;  %v970_v28 = vpop.permute.xlu0 %969  ;;  %v4502_v0 = vpack.c.bf16 %v1802_v63, %v1801_v62 }
0x100d   :  { %v1407_v13 = vmul.f32 %v4623_v2, %v4615_v45  ;;  %v4625_v35 = vpop.eup %4624  ;;  %v978_v31 = vsel %vm977_vm12, %v976_v30, %v970_v28  ;;  %v1804_v2 = vld [vmem:[%s5537_s5 + $0x18] sm:$0xff]  ;;  %v1905_v30 = vld [vmem:[%s5538_s6 + $0x28] sm:$0xff] }
0x100e   :  { %4244 = vmatmul.mubr.msk.f32.vlgmr.msra.gmra.mrb[24].mxu1 %vm387_vm9, %v1240_v1  ;;  %v1574_v5 = vmul.f32 %v4625_v35, %v4617_v56  ;;  %v1803_v1 = vld [vmem:[%s5537_s5 + $0x10] sm:$0xff] }
0x100f   :  { %4252 = vmatpush3.msk.msra.mxu1 %vm159_vm2, %v1409_v4  ;;  %4253 = vmatprep.mubr.msk.f32.mxu1 %vm4707_vm6, %v4706_v32  ;;  %v4506_v4 = vpack.c.bf16 %v1804_v2, %v1803_v1 }
0x1010   :  { %4261 = vmatprep.subr.mxu1 %v4706_v32 }
0x1012   :  { %4254 = vmatmul.mubr.msk.f32.vlgmr.msra.gmra.mrb[26].mxu1 %vm387_vm9, %v1407_v13 }
0x1013   :  { %4262 = vmatpush3.msk.msra.mxu1 %vm159_vm2, %v1576_v53  ;;  %4263 = vmatprep.mubr.msk.f32.mxu1 %vm4707_vm6, %v4706_v32 }
0x1014   :  { %4503 = vmatprep.subr.bf16.mxu1 %v4502_v0 }
0x1016   :  { %4264 = vmatmul.mubr.msk.f32.vlgmr.msra.gmra.mrb[28].mxu1 %vm387_vm9, %v1574_v5 }
0x1017   :  { %4505 = vmatpush3.bf16.msra.mxu1 %v4502_v0 }
0x1018   :  { %4507 = vmatprep.subr.bf16.mxu1 %v4506_v4 }
0x101b   :  { %4509 = vmatpush3.bf16.msra.mxu1 %v4506_v4 }
0x10e1   :  { %v1314_v12 = vpop.f32.mrb[24].mxu1 }
0x10e2   :  { %1653 = vrot.lane.b32.xlu1 %v1314_v12, %s4719_s1  ;;  %v4245_v14 = vpop.f32.mrb[25].mxu1  ;;  %v1798_v12 = vrot.slane %v4914_v20, %v4872_v41 }
0x10e5   :  { %v1481_v15 = vpop.f32.mrb[26].mxu1 }
0x10e6   :  { %1657 = vrot.lane.b32.xlu1 %v1481_v15, %s4720_s27  ;;  %v4255_v16 = vpop.f32.mrb[27].mxu1 }
0x10e9   :  { %v1648_v17 = vpop.f32.mrb[28].mxu1 }
0x10ea   :  { %1661 = vrot.lane.b32.xlu1 %v1648_v17, %s4721_s14  ;;  %v4265_v18 = vpop.f32.mrb[29].mxu1 }
0x10ee   :  { %973 = vrot.lane.b32.xlu1 %v5035_v61, %s4721_s14 }
0x1154   :  { %v1654_v22 = vpop.permute.xlu1 %1653 }
0x1155   :  { %v1664_v25 = vsel %vm297_vm7, %v5066_v34, %v1654_v22  ;;  %v1759_v34 = vsub.s32 5, %v4869_v40 }
0x1157   :  { %v1760_v43 = vrot.slane %v4914_v20, %v1759_v34 }
0x1158   :  { %v1658_v24 = vpop.permute.xlu1 %1657 }
0x1159   :  { %v1665_v26 = vsel %vm977_vm12, %v1664_v25, %v1658_v24  ;;  %v1901_v24 = vld [vmem:[%s5538_s6 + $0x8] sm:$0xff] }
0x115a   :  { %v4510_v25 = vpack.c.bf16 %v1901_v24, %v1900_v23 }
0x115c   :  { %v1662_v27 = vpop.permute.xlu1 %1661  ;;  %4511 = vmatprep.subr.bf16.mxu0 %v4510_v25 }
0x115d   :  { %v1666_v29 = vsel %vm979_vm11, %v1665_v26, %v1662_v27  ;;  %v1902_v26 = vld [vmem:[%s5538_s6 + $0x10] sm:$0xff]  ;;  %v1903_v27 = vld [vmem:[%s5538_s6 + $0x18] sm:$0xff] }
0x115e   :  { %v1668_v61 = vrot.slane %v1666_v29, 3  ;;  %v4514_v28 = vpack.c.bf16 %v1903_v27, %v1902_v26  ;;  %v1904_v29 = vld [vmem:[%s5538_s6 + $0x20] sm:$0xff] }
0x1160   :  { %v974_v37 = vpop.permute.xlu1 %973 }
0x1161   :  { %v980_v39 = vsel %vm979_vm11, %v978_v31, %v974_v37  ;;  %v4518_v31 = vpack.c.bf16 %v1905_v30, %v1904_v29  ;;  %v1907_v37 = vld [vmem:[%s5538_s6 + $0x38] sm:$0xff] }
0x1162   :  { %v1670_v42 = vsel %vm159_vm2, %v980_v39, %v1668_v61 }
0x1163   :  { %4274 = vmatprep.mubr.msk.f32.mxu0 %vm164_vm4, %v1670_v42  ;;  %v1807_v42 = vsub.s32 6, %v4869_v40 }
0x1164   :  { %4275 = vmatmul.mubr.msk.f32.vlgmr.msra.gmra.mrb[6].mxu0 %vm164_vm4, %v1668_v61  ;;  %v1906_v61 = vld [vmem:[%s5538_s6 + $0x30] sm:$0xff] }
0x1165   :  { %4513 = vmatpush3.bf16.msra.mxu0 %v4510_v25  ;;  %v4522_v39 = vpack.c.bf16 %v1907_v37, %v1906_v61 }
0x1166   :  { %4515 = vmatprep.subr.bf16.mxu0 %v4514_v28 }
0x1169   :  { %4517 = vmatpush3.bf16.msra.mxu0 %v4514_v28  ;;  %v5228_v28 = vld [vmem:[%s5539_s7 + $0x8] sm:$0xff] }
0x116a   :  { %4519 = vmatprep.subr.bf16.mxu0 %v4518_v31  ;;  %v2028_v29 = vrot.slane %v5228_v28, %v4909_v19 }
0x116d   :  { %4521 = vmatpush3.bf16.msra.mxu0 %v4518_v31 }
0x116e   :  { %4523 = vmatprep.subr.bf16.mxu0 %v4522_v39 }
0x1171   :  { %4525 = vmatpush3.bf16.msra.mxu0 %v4522_v39  ;;  %v2034_v39 = vrot.slane %v5228_v28, %v4917_v21 }
0x1172   :  { %4328 = vmatprep.subr.mxu0 %v4706_v32 }
0x1237   :  { %v4276_v44 = vpop.f32.mrb[6].mxu0 }
0x1238   :  { %v1756_v59 = vadd.f32 %v4276_v44, %v4881_v54  ;;  %v1746_v45 = vpop.f32.mrb[7].mxu0 }
0x1239   :  { %v1755_v46 = vadd.f32 %v1746_v45, %v4886_v57 }
0x123a   :  { %v5128_v47 = vadd.f32 %v1760_v43, %v1756_v59 }
0x123b   :  { %v5130_v48 = vadd.f32 %v1760_v43, %v1755_v46  ;;  %v1808_v43 = vrot.slane %v4914_v20, %v1807_v42 }
0x123c   :  { %v1766_v49 = vsel %vm168_vm5, %v5128_v47, 0.0 }
0x123d   :  { %1767 = vadd.xlane.f32.xlu1 %v1766_v49  ;;  %v1763_v50 = vsel %vm164_vm4, %v5130_v48, 0.0 }
0x123e   :  { %1764 = vadd.xlane.f32.xlu0 %v1763_v50 }
0x12ca   :  { %v1768_v51 = vpop.xlane.xlu1 %1767 }
0x12cb   :  { %v1770_v52 = vmul.f32 0.03125, %v1768_v51  ;;  %v1765_v55 = vpop.xlane.xlu0 %1764 }
0x12cc   :  { %v1769_v56 = vmul.f32 0.03125, %v1765_v55 }
0x12cd   :  { %v1772_v54 = vsub.f32 %v5128_v47, %v1770_v52 }
0x12ce   :  { %v1771_v57 = vsub.f32 %v5130_v48, %v1769_v56 }
0x12cf   :  { %v1774_v60 = vmul.f32 %v1772_v54, %v1772_v54 }
0x12d0   :  { %v1773_v58 = vmul.f32 %v1771_v57, %v1771_v57 }
0x12d1   :  { %v1778_v38 = vsel %vm168_vm5, %v1774_v60, 0.0  ;;  %v1993_v60 = vsub.s32 7, %v4869_v40  ;;  %v3851_v40 = vld [vmem:[%s5540_s8] sm:$0xff] }
0x12d2   :  { %v1775_v36 = vsel %vm164_vm4, %v1773_v58, 0.0 }
0x12d3   :  { %1776 = vadd.xlane.f32.xlu0 %v1775_v36 }
0x12d7   :  { %1779 = vadd.xlane.f32.xlu0 %v1778_v38  ;;  %v1994_v38 = vrot.slane %v4914_v20, %v1993_v60 }
0x1360   :  { %v1777_v13 = vpop.xlane.xlu0 %1776 }
0x1361   :  { %v1781_v35 = vmul.f32 0.03125, %v1777_v13 }
0x1363   :  { %v1783_v53 = vadd.f32 1e-06, %v1781_v35 }
0x1364   :  { %v1780_v5 = vpop.xlane.xlu0 %1779 }
0x1365   :  { %4626 = vrsqrt.f32 %v1783_v53  ;;  %v1782_v6 = vmul.f32 0.03125, %v1780_v5 }
0x1367   :  { %v1784_v7 = vadd.f32 1e-06, %v1782_v6 }
0x1369   :  { %4628 = vrsqrt.f32 %v1784_v7 }
0x136f   :  { %v4627_v10 = vpop.eup %4626 }
0x1370   :  { %v1787_v11 = vmul.f32 %v4627_v10, %v1771_v57 }
0x1372   :  { %v1793_v14 = vmul.f32 %v1792_v9, %v1787_v11 }
0x1373   :  { %v4629_v15 = vpop.eup %4628 }
0x1374   :  { %v1788_v16 = vmul.f32 %v4629_v15, %v1772_v54  ;;  %v1799_v17 = vadd.f32 %v1798_v12, %v1793_v14  ;;  %v3990_v14 = vld [vmem:[%s5535_s3 + $0x28] sm:$0xff] }
0x1376   :  { %v1794_v18 = vmul.f32 %v1792_v9, %v1788_v16  ;;  %4285 = vmatprep.mubr.msk.f32.mxu1 %vm164_vm4, %v1799_v17  ;;  %v3991_v16 = vld [vmem:[%s5535_s3 + $0x30] sm:$0xff]  ;;  %v3992_v17 = vld [vmem:[%s5535_s3 + $0x38] sm:$0xff] }
0x1378   :  { %v1800_v22 = vadd.f32 %v1798_v12, %v1794_v18  ;;  %v3989_v12 = vld [vmem:[%s5535_s3 + $0x20] sm:$0xff]  ;;  %v4530_v18 = vpack.c.bf16 %v3992_v17, %v3991_v16 }
0x1379   :  { %v4526_v15 = vpack.c.bf16 %v3990_v14, %v3989_v12 }
0x137a   :  { %4286 = vmatmul.mubr.msk.f32.vlgmr.msra.gmra.mrb[30].mxu1 %vm164_vm4, %v1800_v22 }
0x137b   :  { %4527 = vmatprep.subr.bf16.mxu1 %v4526_v15 }
0x137c   :  { %4529 = vmatpush3.bf16.msra.mxu1 %v4526_v15 }
0x137d   :  { %4531 = vmatprep.subr.bf16.mxu1 %v4530_v18 }
0x1380   :  { %4533 = vmatpush3.bf16.msra.mxu1 %v4530_v18 }
0x1381   :  { %4318 = vmatprep.subr.mxu1 %v4706_v32 }
0x144d   :  { %v4287_v44 = vpop.f32.mrb[30].mxu1 }
0x144e   :  { %v1887_v59 = vadd.f32 %v4287_v44, %v1808_v43  ;;  %v1881_v45 = vpop.f32.mrb[31].mxu1 }
0x144f   :  { %v1882_v46 = vadd.f32 %v1881_v45, %v1808_v43 }
0x1450   :  { %v1893_v49 = vmul.f32 0.70710677, %v1887_v59  ;;  %v1891_v57 = vmul.f32 0.5, %v1887_v59 }
0x1451   :  { %v1892_v50 = vmul.f32 0.70710677, %v1882_v46  ;;  %v1890_v56 = vmul.f32 0.5, %v1882_v46  ;;  %v2045_v46 = vrot.slane %v5228_v28, %v211_v33 }
0x1452   :  { %4630 = verf.f32 %v1893_v49 }
0x1453   :  { %4632 = verf.f32 %v1892_v50 }
0x145c   :  { %v4631_v51 = vpop.eup %4630 }
0x145d   :  { %v4633_v52 = vpop.eup %4632  ;;  %v1897_v55 = vadd.f32 1.0, %v4631_v51 }
0x145e   :  { %v1896_v54 = vadd.f32 1.0, %v4633_v52 }
0x145f   :  { %v1899_v36 = vmul.f32 %v1897_v55, %v1891_v57 }
0x1460   :  { %v1898_v58 = vmul.f32 %v1896_v54, %v1890_v56 }
0x1462   :  { %4304 = vmatprep.mubr.msk.f32.mxu0 %vm67_vm0, %v1898_v58 }
0x1463   :  { %4305 = vmatmul.mubr.msk.f32.vlgmr.msra.gmra.mrb[8].mxu0 %vm67_vm0, %v1899_v36 }
0x1464   :  { %4330 = vmatprep.mubr.msk.f32.mxu0 %vm4707_vm6, %v4706_v32 }
0x1536   :  { %v4306_v62 = vpop.f32.mrb[8].mxu0 }
0x1537   :  { %v1990_v63 = vadd.f32 %v4306_v62, %v5128_v47  ;;  %v1980_v0 = vpop.f32.mrb[9].mxu0 }
0x1538   :  { %v1989_v1 = vadd.f32 %v1980_v0, %v5130_v48 }
0x1539   :  { %v5200_v2 = vadd.f32 %v1994_v38, %v1990_v63 }
0x153a   :  { %v5202_v4 = vadd.f32 %v1994_v38, %v1989_v1 }
0x153b   :  { %v2002_v13 = vsel %vm168_vm5, %v5200_v2, 0.0 }
0x153c   :  { %2003 = vadd.xlane.f32.xlu1 %v2002_v13  ;;  %v1999_v35 = vsel %vm164_vm4, %v5202_v4, 0.0 }
0x153d   :  { %2000 = vadd.xlane.f32.xlu0 %v1999_v35 }
0x15c9   :  { %v2004_v53 = vpop.xlane.xlu1 %2003 }
0x15ca   :  { %v2006_v20 = vmul.f32 0.03125, %v2004_v53  ;;  %v2001_v5 = vpop.xlane.xlu0 %2000 }
0x15cb   :  { %v2005_v6 = vmul.f32 0.03125, %v2001_v5 }
0x15cc   :  { %v2008_v47 = vsub.f32 %v5200_v2, %v2006_v20 }
0x15cd   :  { %v2007_v48 = vsub.f32 %v5202_v4, %v2005_v6 }
0x15ce   :  { %v2010_v7 = vmul.f32 %v2008_v47, %v2008_v47 }
0x15cf   :  { %v2009_v9 = vmul.f32 %v2007_v48, %v2007_v48 }
0x15d0   :  { %v2014_v10 = vsel %vm168_vm5, %v2010_v7, 0.0 }
0x15d1   :  { %2015 = vadd.xlane.f32.xlu1 %v2014_v10  ;;  %v2011_v11 = vsel %vm164_vm4, %v2009_v9, 0.0 }
0x15d2   :  { %2012 = vadd.xlane.f32.xlu0 %v2011_v11 }
0x165e   :  { %v2016_v22 = vpop.xlane.xlu1 %2015 }
0x165f   :  { %v2018_v23 = vmul.f32 0.03125, %v2016_v22  ;;  %v2013_v24 = vpop.xlane.xlu0 %2012 }
0x1660   :  { %v2017_v25 = vmul.f32 0.03125, %v2013_v24 }
0x1661   :  { %v2020_v26 = vadd.f32 1e-06, %v2018_v23 }
0x1662   :  { %v2019_v27 = vadd.f32 1e-06, %v2017_v25 }
0x1663   :  { %4634 = vrsqrt.f32 %v2020_v26 }
0x1664   :  { %4636 = vrsqrt.f32 %v2019_v27 }
0x166d   :  { %v4635_v30 = vpop.eup %4634 }
0x166e   :  { %v4637_v31 = vpop.eup %4636  ;;  %v2024_v61 = vmul.f32 %v4635_v30, %v2008_v47 }
0x166f   :  { %v2023_v37 = vmul.f32 %v4637_v31, %v2007_v48 }
0x1670   :  { %v2030_v43 = vmul.f32 %v2028_v29, %v2024_v61 }
0x1671   :  { %v2029_v44 = vmul.f32 %v2028_v29, %v2023_v37 }
0x1672   :  { %v2036_v45 = vadd.f32 %v2034_v39, %v2030_v43 }
0x1673   :  { %v2035_v59 = vadd.f32 %v2034_v39, %v2029_v44 }
0x1675   :  { %4315 = vmatprep.mubr.msk.f32.mxu1 %vm164_vm4, %v2035_v59 }
0x1676   :  { %4316 = vmatmul.mubr.msk.f32.vlgmr.msra.gmra.mrb[32].mxu1 %vm164_vm4, %v2036_v45 }
0x1677   :  { %4320 = vmatprep.mubr.msk.f32.mxu1 %vm4707_vm6, %v4706_v32 }
0x1749   :  { %v4317_v49 = vpop.f32.mrb[32].mxu1 }
0x174a   :  { %v2118_v50 = vpop.f32.mrb[33].mxu1  ;;  %v2124_v52 = vadd.f32 %v4317_v49, %v2045_v46 }
0x174b   :  { %v5241_v51 = vadd.f32 %v2118_v50, %v2045_v46 }
0x174c   :  { %v2811_v55 = vrot.slane %v2124_v52, 5 }
0x174d   :  { %2295 = vrot.lane.b32.xlu1 %v5241_v51, %s4709_s17  ;;  %2128 = vrot.lane.b32.xlu0 %v5241_v51, %s4708_s16  ;;  %v2810_v33 = vrot.slane %v5241_v51, 5 }
0x174f   :  { %v5257_v56 = vsel %vm982_vm10, %v2810_v33, %v2811_v55 }
0x1751   :  { %2293 = vrot.lane.b32.xlu1 %v5241_v51, %s4711_s19  ;;  %2460 = vrot.lane.b32.xlu0 %v5241_v51, %s4713_s21 }
0x1755   :  { %2462 = vrot.lane.b32.xlu1 %v5241_v51, %s4714_s22  ;;  %2627 = vrot.lane.b32.xlu0 %v5241_v51, %s4716_s24 }
0x1759   :  { %2629 = vrot.lane.b32.xlu1 %v5241_v51, %s4715_s23  ;;  %2980 = vrot.lane.b32.xlu0 %v5257_v56, %s4709_s17 }
0x175d   :  { %3147 = vrot.lane.b32.xlu0 %v5257_v56, %s4714_s22  ;;  %2813 = vrot.lane.b32.xlu1 %v5257_v56, %s4708_s16 }
0x1761   :  { %3314 = vrot.lane.b32.xlu0 %v5257_v56, %s4715_s23  ;;  %2978 = vrot.lane.b32.xlu1 %v5257_v56, %s4711_s19 }
0x1765   :  { %3145 = vrot.lane.b32.xlu1 %v5257_v56, %s4713_s21 }
0x1769   :  { %3312 = vrot.lane.b32.xlu1 %v5257_v56, %s4716_s24 }
0x17bf   :  { %v2296_v54 = vpop.permute.xlu1 %2295  ;;  %v2129_v57 = vpop.permute.xlu0 %2128 }
0x17c0   :  { %4319 = vmatpush3.xpose.msk.msra.mxu1 %vm297_vm7, %v2129_v57  ;;  %4329 = vmatpush3.xpose.msk.msra.mxu0 %vm297_vm7, %v2296_v54 }
0x17c1   :  { %4338 = vmatprep.subr.mxu0 %v4706_v32  ;;  %4323 = vmatprep.subr.mxu1 %v4706_v32 }
0x17c3   :  { %v2294_v58 = vpop.permute.xlu1 %2293  ;;  %4321 = vmatmul.mubr.msk.f32.vlgmr.msra.gmra.mrb[34].mxu1 %vm297_vm7, %v5241_v51  ;;  %v2461_v36 = vpop.permute.xlu0 %2460 }
0x17c4   :  { %4331 = vmatmul.mubr.msk.f32.vlgmr.msra.gmra.mrb[10].mxu0 %vm297_vm7, %v2294_v58  ;;  %4325 = vmatprep.mubr.msk.f32.mxu1 %vm4707_vm6, %v4706_v32 }
0x17c5   :  { %4340 = vmatprep.mubr.msk.f32.mxu0 %vm4707_vm6, %v4706_v32 }
0x17c7   :  { %v2463_v38 = vpop.permute.xlu1 %2462  ;;  %v2628_v62 = vpop.permute.xlu0 %2627 }
0x17c8   :  { %4339 = vmatpush3.xpose.msk.msra.mxu0 %vm297_vm7, %v2463_v38 }
0x17c9   :  { %4348 = vmatprep.subr.mxu0 %v4706_v32 }
0x17cb   :  { %v2630_v63 = vpop.permute.xlu1 %2629  ;;  %4341 = vmatmul.mubr.msk.f32.vlgmr.msra.gmra.mrb[12].mxu0 %vm297_vm7, %v2461_v36  ;;  %v2981_v0 = vpop.permute.xlu0 %2980 }
0x17cc   :  { %4349 = vmatpush3.xpose.msk.msra.mxu0 %vm297_vm7, %v2630_v63  ;;  %4350 = vmatprep.mubr.msk.f32.mxu0 %vm4707_vm6, %v4706_v32 }
0x17cd   :  { %4358 = vmatprep.subr.mxu0 %v4706_v32 }
0x17cf   :  { %4351 = vmatmul.mubr.msk.f32.vlgmr.msra.gmra.mrb[14].mxu0 %vm297_vm7, %v2628_v62  ;;  %v2814_v1 = vpop.permute.xlu1 %2813  ;;  %v3148_v35 = vpop.permute.xlu0 %3147 }
0x17d0   :  { %4359 = vmatpush3.xpose.msk.msra.mxu0 %vm297_vm7, %v2814_v1  ;;  %4360 = vmatprep.mubr.msk.f32.mxu0 %vm4707_vm6, %v4706_v32 }
0x17d1   :  { %4368 = vmatprep.subr.mxu0 %v4706_v32 }
0x17d3   :  { %4361 = vmatmul.mubr.msk.f32.vlgmr.msra.gmra.mrb[16].mxu0 %vm297_vm7, %v5257_v56  ;;  %v2979_v13 = vpop.permute.xlu1 %2978  ;;  %v3315_v20 = vpop.permute.xlu0 %3314 }
0x17d4   :  { %4369 = vmatpush3.xpose.msk.msra.mxu0 %vm297_vm7, %v2981_v0  ;;  %4370 = vmatprep.mubr.msk.f32.mxu0 %vm4707_vm6, %v4706_v32 }
0x17d5   :  { %4378 = vmatprep.subr.mxu0 %v4706_v32 }
0x17d7   :  { %4371 = vmatmul.mubr.msk.f32.vlgmr.msra.gmra.mrb[18].mxu0 %vm297_vm7, %v2979_v13  ;;  %v3146_v53 = vpop.permute.xlu1 %3145 }
0x17d8   :  { %4379 = vmatpush3.xpose.msk.msra.mxu0 %vm297_vm7, %v3148_v35  ;;  %4380 = vmatprep.mubr.msk.f32.mxu0 %vm4707_vm6, %v4706_v32 }
0x17d9   :  { %4388 = vmatprep.subr.mxu0 %v4706_v32 }
0x17db   :  { %4381 = vmatmul.mubr.msk.f32.vlgmr.msra.gmra.mrb[20].mxu0 %vm297_vm7, %v3146_v53  ;;  %v3313_v5 = vpop.permute.xlu1 %3312 }
0x17dc   :  { %4389 = vmatpush3.xpose.msk.msra.mxu0 %vm297_vm7, %v3315_v20  ;;  %4390 = vmatprep.mubr.msk.f32.mxu0 %vm4707_vm6, %v4706_v32 }
0x17df   :  { %4391 = vmatmul.mubr.msk.f32.vlgmr.msra.gmra.mrb[22].mxu0 %vm297_vm7, %v3313_v5 }
0x1896   :  { %v2200_v6 = vpop.f32.mrb[34].mxu1 }
0x1897   :  { %v2204_v47 = vmul.f32 0.35355338, %v2200_v6  ;;  %v4322_v48 = vpop.f32.mrb[35].mxu1  ;;  %v2367_v7 = vpop.f32.mrb[10].mxu0 }
0x1898   :  { %v2371_v9 = vmul.f32 0.35355338, %v2367_v7  ;;  %v4332_v10 = vpop.f32.mrb[11].mxu0 }
0x1899   :  { %v2205_v11 = vsel %vm373_vm8, %v2204_v47, -inf }
0x189a   :  { %2206 = vmax.xlane.f32.xlu0 %v2205_v11  ;;  %v2372_v12 = vsel %vm373_vm8, %v2371_v9, -inf }
0x189b   :  { %2373 = vmax.xlane.f32.xlu1 %v2372_v12 }
0x189e   :  { %v2534_v14 = vpop.f32.mrb[12].mxu0 }
0x189f   :  { %v5316_v15 = vmul.f32 0.35355338, %v2534_v14  ;;  %v4342_v16 = vpop.f32.mrb[13].mxu0 }
0x18a1   :  { %v2539_v17 = vsel %vm373_vm8, %v5316_v15, -inf }
0x18a2   :  { %v2701_v18 = vpop.f32.mrb[14].mxu0  ;;  %2540 = vmax.xlane.f32.xlu0 %v2539_v17 }
0x18a3   :  { %v2705_v22 = vmul.f32 0.35355338, %v2701_v18  ;;  %v4352_v23 = vpop.f32.mrb[15].mxu0 }
0x18a5   :  { %v2706_v24 = vsel %vm373_vm8, %v2705_v22, -inf }
0x18a6   :  { %2707 = vmax.xlane.f32.xlu0 %v2706_v24  ;;  %v2885_v25 = vpop.f32.mrb[16].mxu0 }
0x18a7   :  { %v2889_v26 = vmul.f32 0.35355338, %v2885_v25  ;;  %v4362_v27 = vpop.f32.mrb[17].mxu0 }
0x18a9   :  { %v2890_v29 = vsel %vm373_vm8, %v2889_v26, -inf }
0x18aa   :  { %2891 = vmax.xlane.f32.xlu0 %v2890_v29  ;;  %v3052_v30 = vpop.f32.mrb[18].mxu0 }
0x18ab   :  { %v3056_v31 = vmul.f32 0.35355338, %v3052_v30  ;;  %v4372_v61 = vpop.f32.mrb[19].mxu0 }
0x18ad   :  { %v3057_v37 = vsel %vm373_vm8, %v3056_v31, -inf }
0x18ae   :  { %3058 = vmax.xlane.f32.xlu1 %v3057_v37  ;;  %v3219_v39 = vpop.f32.mrb[20].mxu0 }
0x18af   :  { %v3223_v43 = vmul.f32 0.35355338, %v3219_v39  ;;  %v4382_v44 = vpop.f32.mrb[21].mxu0 }
0x18b1   :  { %v3224_v59 = vsel %vm373_vm8, %v3223_v43, -inf }
0x18b2   :  { %3225 = vmax.xlane.f32.xlu0 %v3224_v59  ;;  %v3386_v45 = vpop.f32.mrb[22].mxu0 }
0x18b3   :  { %v4392_v46 = vpop.f32.mrb[23].mxu0  ;;  %v3390_v49 = vmul.f32 0.35355338, %v3386_v45 }
0x18b5   :  { %v3391_v50 = vsel %vm373_vm8, %v3390_v49, -inf }
0x18bf   :  { %2216 = vrot.lane.b32.xlu1 %v5241_v51, %s4710_s18 }
0x18e3   :  { %3392 = vmax.xlane.f32.xlu1 %v3391_v50 }
0x18f4   :  { %2550 = vrot.lane.b32.xlu1 %v5241_v51, %s4717_s25 }
0x18f8   :  { %2717 = vrot.lane.b32.xlu1 %v5241_v51, %s4718_s26 }
0x18fc   :  { %2901 = vrot.lane.b32.xlu1 %v5257_v56, %s4710_s18 }
0x1927   :  { %v2207_v52 = vpop.xlane.xlu0 %2206 }
0x1928   :  { %v2208_v55 = vsub.f32 %v2204_v47, %v2207_v52  ;;  %v2374_v33 = vpop.xlane.xlu1 %2373 }
0x1929   :  { %v2375_v54 = vsub.f32 %v2371_v9, %v2374_v33 }
0x192a   :  { %v2209_v57 = vmul.f32 1.442695, %v2208_v55 }
0x192b   :  { %v2376_v58 = vmul.f32 1.442695, %v2375_v54 }
0x192c   :  { %4638 = vpow2.f32 %v2209_v57 }
0x192d   :  { %4640 = vpow2.f32 %v2376_v58 }
0x192f   :  { %v2541_v36 = vpop.xlane.xlu0 %2540 }
0x1930   :  { %v2542_v47 = vsub.f32 %v5316_v15, %v2541_v36 }
0x1932   :  { %v2543_v7 = vmul.f32 1.442695, %v2542_v47 }
0x1933   :  { %v2708_v38 = vpop.xlane.xlu0 %2707 }
0x1934   :  { %v2709_v62 = vsub.f32 %v2705_v22, %v2708_v38 }
0x1936   :  { %v4639_v63 = vpop.eup %4638  ;;  %v2710_v0 = vmul.f32 1.442695, %v2709_v62 }
0x1937   :  { %v5333_v1 = vpop.eup %4640  ;;  %v2211_v13 = vsel %vm373_vm8, %v4639_v63, 0.0  ;;  %v2892_v48 = vpop.xlane.xlu0 %2891 }
0x1938   :  { %4642 = vpow2.f32 %v2710_v0  ;;  %2212 = vadd.xlane.f32.xlu0 %v2211_v13  ;;  %v2378_v35 = vsel %vm373_vm8, %v5333_v1, 0.0  ;;  %v2893_v9 = vsub.f32 %v2889_v26, %v2892_v48 }
0x1939   :  { %2379 = vadd.xlane.f32.xlu1 %v2378_v35  ;;  %4644 = vpow2.f32 %v2543_v7 }
0x193a   :  { %v2894_v11 = vmul.f32 1.442695, %v2893_v9 }
0x193b   :  { %v3059_v53 = vpop.xlane.xlu1 %3058 }
0x193c   :  { %4646 = vpow2.f32 %v2894_v11  ;;  %v3060_v14 = vsub.f32 %v3056_v31, %v3059_v53 }
0x193e   :  { %v3061_v17 = vmul.f32 1.442695, %v3060_v14 }
0x193f   :  { %v2217_v20 = vpop.permute.xlu1 %2216  ;;  %v3226_v10 = vpop.xlane.xlu0 %3225 }
0x1940   :  { %4324 = vmatpush3.msk.msra.mxu1 %vm159_vm2, %v2217_v20  ;;  %v3227_v12 = vsub.f32 %v3223_v43, %v3226_v10 }
0x1941   :  { %4333 = vmatprep.subr.mxu1 %v4706_v32 }
0x1942   :  { %v5340_v5 = vpop.eup %4642  ;;  %v3228_v16 = vmul.f32 1.442695, %v3227_v12 }
0x1943   :  { %v2712_v6 = vsel %vm373_vm8, %v5340_v5, 0.0  ;;  %v4645_v18 = vpop.eup %4644 }
0x1944   :  { %2713 = vadd.xlane.f32.xlu1 %v2712_v6  ;;  %4648 = vpow2.f32 %v3228_v16 }
0x1945   :  { %4650 = vpow2.f32 %v3061_v17 }
0x1946   :  { %v4647_v22 = vpop.eup %4646 }
0x1947   :  { %v2896_v15 = vsel %vm373_vm8, %v4647_v22, 0.0 }
0x194e   :  { %2383 = vrot.lane.b32.xlu0 %v5241_v51, %s4712_s20  ;;  %v2545_v51 = vsel %vm373_vm8, %v4645_v18, 0.0  ;;  %v5351_v24 = vpop.eup %4648 }
0x194f   :  { %v3230_v27 = vsel %vm373_vm8, %v5351_v24, 0.0  ;;  %v4651_v29 = vpop.eup %4650 }
0x1950   :  { %v3063_v30 = vsel %vm373_vm8, %v4651_v29, 0.0 }
0x1955   :  { %3068 = vrot.lane.b32.xlu1 %v5257_v56, %s4712_s20 }
0x196d   :  { %2546 = vadd.xlane.f32.xlu0 %v2545_v51  ;;  %v4028_v51 = vld [vmem:[%s5536_s4 + $0x28] sm:$0xff] }
0x1970   :  { %v3393_v23 = vpop.xlane.xlu1 %3392 }
0x1971   :  { %v3394_v25 = vsub.f32 %v3390_v49, %v3393_v23  ;;  %2897 = vadd.xlane.f32.xlu0 %v2896_v15 }
0x1973   :  { %v3395_v26 = vmul.f32 1.442695, %v3394_v25  ;;  %v4029_v25 = vld [vmem:[%s5536_s4 + $0x30] sm:$0xff] }
0x1974   :  { %v2551_v37 = vpop.permute.xlu1 %2550 }
0x1975   :  { %4652 = vpow2.f32 %v3395_v26  ;;  %3231 = vadd.xlane.f32.xlu0 %v3230_v27  ;;  %v4030_v26 = vld [vmem:[%s5536_s4 + $0x38] sm:$0xff] }
0x1976   :  { %v4538_v27 = vpack.c.bf16 %v4030_v26, %v4029_v25  ;;  %v3620_v25 = vrot.slane %v5228_v28, %v5153_v8 }
0x1978   :  { %v2718_v39 = vpop.permute.xlu1 %2717 }
0x1979   :  { %3064 = vadd.xlane.f32.xlu1 %v3063_v30 }
0x197c   :  { %v2902_v43 = vpop.permute.xlu1 %2901 }
0x197f   :  { %v5356_v31 = vpop.eup %4652 }
0x1980   :  { %v3397_v61 = vsel %vm373_vm8, %v5356_v31, 0.0 }
0x1981   :  { %3398 = vadd.xlane.f32.xlu0 %v3397_v61 }
0x198a   :  { %3402 = vrot.lane.b32.xlu1 %v5257_v56, %s4718_s26 }
0x1997   :  { %3235 = vrot.lane.b32.xlu0 %v5257_v56, %s4717_s25 }
0x19c5   :  { %v2213_v44 = vpop.xlane.xlu0 %2212 }
0x19c6   :  { %4654 = vrcp.f32 %v2213_v44  ;;  %v2380_v59 = vpop.xlane.xlu1 %2379 }
0x19c7   :  { %4656 = vrcp.f32 %v2380_v59 }
0x19c9   :  { %v2384_v50 = vpop.permute.xlu0 %2383 }
0x19d0   :  { %v4655_v45 = vpop.eup %4654 }
0x19d1   :  { %v2215_v46 = vmul.f32 %v4655_v45, %v4639_v63  ;;  %v4657_v49 = vpop.eup %4656  ;;  %v2714_v52 = vpop.xlane.xlu1 %2713 }
0x19d2   :  { %v2382_v56 = vmul.f32 %v4657_v49, %v5333_v1 }
0x19d3   :  { %4326 = vmatmul.mubr.msk.f32.vlgmr.msra.gmra.mrb[36].mxu1 %vm387_vm9, %v2215_v46 }
0x19d4   :  { %4334 = vmatpush3.msk.msra.mxu1 %vm159_vm2, %v2384_v50  ;;  %4335 = vmatprep.mubr.msk.f32.mxu1 %vm4707_vm6, %v4706_v32 }
0x19d5   :  { %4343 = vmatprep.subr.mxu1 %v4706_v32  ;;  %v3069_v54 = vpop.permute.xlu1 %3068 }
0x19d7   :  { %4336 = vmatmul.mubr.msk.f32.vlgmr.msra.gmra.mrb[38].mxu1 %vm387_vm9, %v2382_v56 }
0x19d8   :  { %4344 = vmatpush3.msk.msra.mxu1 %vm159_vm2, %v2551_v37  ;;  %4345 = vmatprep.mubr.msk.f32.mxu1 %vm4707_vm6, %v4706_v32 }
0x19d9   :  { %4353 = vmatprep.subr.mxu1 %v4706_v32 }
0x19fa   :  { %v2547_v55 = vpop.xlane.xlu0 %2546 }
0x19fb   :  { %4658 = vrcp.f32 %v2547_v55 }
0x19fc   :  { %4660 = vrcp.f32 %v2714_v52 }
0x19fe   :  { %v2898_v33 = vpop.xlane.xlu0 %2897 }
0x19ff   :  { %4662 = vrcp.f32 %v2898_v33 }
0x1a02   :  { %v3232_v36 = vpop.xlane.xlu0 %3231 }
0x1a05   :  { %v4659_v57 = vpop.eup %4658 }
0x1a06   :  { %v2549_v58 = vmul.f32 %v4659_v57, %v4645_v18  ;;  %v3065_v38 = vpop.xlane.xlu1 %3064  ;;  %v4661_v62 = vpop.eup %4660  ;;  %v4027_v18 = vld [vmem:[%s5536_s4 + $0x20] sm:$0xff] }
0x1a07   :  { %4664 = vrcp.f32 %v3065_v38  ;;  %v2716_v63 = vmul.f32 %v4661_v62, %v5340_v5  ;;  %v4534_v23 = vpack.c.bf16 %v4028_v51, %v4027_v18 }
0x1a08   :  { %4346 = vmatmul.mubr.msk.f32.vlgmr.msra.gmra.mrb[40].mxu1 %vm387_vm9, %v2549_v58  ;;  %4666 = vrcp.f32 %v3232_v36  ;;  %v3588_v36 = vrot.slane %v5228_v28, %v1759_v34 }
0x1a09   :  { %4354 = vmatpush3.msk.msra.mxu1 %vm159_vm2, %v2718_v39  ;;  %4355 = vmatprep.mubr.msk.f32.mxu1 %vm4707_vm6, %v4706_v32  ;;  %v4663_v0 = vpop.eup %4662 }
0x1a0a   :  { %4363 = vmatprep.subr.mxu1 %v4706_v32  ;;  %v2900_v1 = vmul.f32 %v4663_v0, %v4647_v22  ;;  %v3403_v47 = vpop.permute.xlu1 %3402  ;;  %4535 = vmatprep.subr.bf16.mxu0 %v4534_v23 }
0x1a0b   :  { %4537 = vmatpush3.bf16.msra.mxu0 %v4534_v23 }
0x1a0c   :  { %4356 = vmatmul.mubr.msk.f32.vlgmr.msra.gmra.mrb[42].mxu1 %vm387_vm9, %v2716_v63  ;;  %4539 = vmatprep.subr.bf16.mxu0 %v4538_v27 }
0x1a0d   :  { %4364 = vmatpush3.msk.msra.mxu1 %vm159_vm2, %v2902_v43  ;;  %4365 = vmatprep.mubr.msk.f32.mxu1 %vm4707_vm6, %v4706_v32 }
0x1a0e   :  { %v3399_v13 = vpop.xlane.xlu0 %3398  ;;  %4373 = vmatprep.subr.mxu1 %v4706_v32 }
0x1a0f   :  { %4668 = vrcp.f32 %v3399_v13  ;;  %4541 = vmatpush3.bf16.msra.mxu0 %v4538_v27 }
0x1a10   :  { %4366 = vmatmul.mubr.msk.f32.vlgmr.msra.gmra.mrb[44].mxu1 %vm387_vm9, %v2900_v1 }
0x1a11   :  { %v4665_v35 = vpop.eup %4664  ;;  %4374 = vmatpush3.msk.msra.mxu1 %vm159_vm2, %v3069_v54  ;;  %4375 = vmatprep.mubr.msk.f32.mxu1 %vm4707_vm6, %v4706_v32 }
0x1a12   :  { %v3067_v53 = vmul.f32 %v4665_v35, %v4651_v29  ;;  %v3236_v20 = vpop.permute.xlu0 %3235  ;;  %4383 = vmatprep.subr.mxu1 %v4706_v32  ;;  %v4667_v5 = vpop.eup %4666 }
0x1a13   :  { %v3234_v6 = vmul.f32 %v4667_v5, %v5351_v24 }
0x1a14   :  { %4376 = vmatmul.mubr.msk.f32.vlgmr.msra.gmra.mrb[46].mxu1 %vm387_vm9, %v3067_v53 }
0x1a15   :  { %4384 = vmatpush3.msk.msra.mxu1 %vm159_vm2, %v3236_v20  ;;  %4385 = vmatprep.mubr.msk.f32.mxu1 %vm4707_vm6, %v4706_v32 }
0x1a16   :  { %4393 = vmatprep.subr.mxu1 %v4706_v32 }
0x1a18   :  { %4386 = vmatmul.mubr.msk.f32.vlgmr.msra.gmra.mrb[48].mxu1 %vm387_vm9, %v3234_v6 }
0x1a19   :  { %v4669_v48 = vpop.eup %4668  ;;  %4394 = vmatpush3.msk.msra.mxu1 %vm159_vm2, %v3403_v47  ;;  %4395 = vmatprep.mubr.msk.f32.mxu1 %vm4707_vm6, %v4706_v32 }
0x1a1a   :  { %v3401_v7 = vmul.f32 %v4669_v48, %v5356_v31 }
0x1a1c   :  { %4396 = vmatmul.mubr.msk.f32.vlgmr.msra.gmra.mrb[50].mxu1 %vm387_vm9, %v3401_v7 }
0x1aa6   :  { %v2289_v9 = vpop.f32.mrb[36].mxu1 }
0x1aa7   :  { %v4327_v10 = vpop.f32.mrb[37].mxu1 }
0x1aa8   :  { %v4033_v10 = vld [vmem:[%s5537_s5 + $0x20] sm:$0xff] }
0x1aaa   :  { %v2456_v11 = vpop.f32.mrb[38].mxu1 }
0x1aab   :  { %2795 = vrot.lane.b32.xlu0 %v2456_v11, %s4719_s1  ;;  %v4337_v12 = vpop.f32.mrb[39].mxu1  ;;  %v4034_v11 = vld [vmem:[%s5537_s5 + $0x28] sm:$0xff] }
0x1aac   :  { %v4542_v12 = vpack.c.bf16 %v4034_v11, %v4033_v10 }
0x1aae   :  { %4543 = vmatprep.subr.bf16.mxu1 %v4542_v12 }
0x1aaf   :  { %4545 = vmatpush3.bf16.msra.mxu1 %v4542_v12 }
0x1adb   :  { %v2623_v14 = vpop.f32.mrb[40].mxu1 }
0x1adc   :  { %v4347_v16 = vpop.f32.mrb[41].mxu1 }
0x1add   :  { %v4036_v16 = vld [vmem:[%s5537_s5 + $0x38] sm:$0xff] }
0x1adf   :  { %v2790_v17 = vpop.f32.mrb[42].mxu1 }
0x1ae0   :  { %v4357_v22 = vpop.f32.mrb[43].mxu1 }
0x1ae3   :  { %v2974_v15 = vpop.f32.mrb[44].mxu1 }
0x1ae4   :  { %v4367_v24 = vpop.f32.mrb[45].mxu1 }
0x1ae7   :  { %v3141_v29 = vpop.f32.mrb[46].mxu1 }
0x1ae8   :  { %3480 = vrot.lane.b32.xlu0 %v3141_v29, %s4719_s1  ;;  %v4377_v30 = vpop.f32.mrb[47].mxu1  ;;  %v3626_v29 = vrot.slane %v5228_v28, %v4872_v41  ;;  %v4040_v41 = vld [vmem:[%s5538_s6 + $0x48] sm:$0xff] }
0x1aeb   :  { %v3308_v31 = vpop.f32.mrb[48].mxu1 }
0x1aec   :  { %2799 = vrot.lane.b32.xlu0 %v2623_v14, %s4720_s27  ;;  %3484 = vrot.lane.b32.xlu1 %v3308_v31, %s4720_s27  ;;  %v4387_v61 = vpop.f32.mrb[49].mxu1  ;;  %v4035_v14 = vld [vmem:[%s5537_s5 + $0x30] sm:$0xff] }
0x1aef   :  { %v3475_v37 = vpop.f32.mrb[50].mxu1 }
0x1af0   :  { %3488 = vrot.lane.b32.xlu1 %v3475_v37, %s4721_s14  ;;  %v4397_v39 = vpop.f32.mrb[51].mxu1 }
0x1af4   :  { %2803 = vrot.lane.b32.xlu1 %v2790_v17, %s4721_s14  ;;  %v4546_v17 = vpack.c.bf16 %v4036_v16, %v4035_v14 }
0x1af6   :  { %4547 = vmatprep.subr.bf16.mxu1 %v4546_v17 }
0x1af7   :  { %4549 = vmatpush3.bf16.msra.mxu1 %v4546_v17 }
0x1af8   :  { %4566 = vmatprep.subr.bf16.mxu1 %v4705_v3 }
0x1b1d   :  { %v2796_v43 = vpop.permute.xlu0 %2795 }
0x1b1e   :  { %v2806_v52 = vsel %vm297_vm7, %v2289_v9, %v2796_v43 }
0x1b5a   :  { %v3481_v44 = vpop.permute.xlu0 %3480 }
0x1b5b   :  { %v3491_v45 = vsel %vm297_vm7, %v2974_v15, %v3481_v44  ;;  %v4039_v44 = vld [vmem:[%s5538_s6 + $0x40] sm:$0xff] }
0x1b5e   :  { %v3485_v59 = vpop.permute.xlu1 %3484  ;;  %v2800_v50 = vpop.permute.xlu0 %2799 }
0x1b5f   :  { %v3492_v46 = vsel %vm977_vm12, %v3491_v45, %v3485_v59  ;;  %v2807_v55 = vsel %vm977_vm12, %v2806_v52, %v2800_v50  ;;  %v4550_v59 = vpack.c.bf16 %v4040_v41, %v4039_v44  ;;  %v4041_v45 = vld [vmem:[%s5538_s6 + $0x50] sm:$0xff]  ;;  %v4044_v50 = vld [vmem:[%s5538_s6 + $0x68] sm:$0xff] }
0x1b60   :  { %v4045_v52 = vld [vmem:[%s5538_s6 + $0x70] sm:$0xff] }
0x1b61   :  { %4551 = vmatprep.subr.bf16.mxu0 %v4550_v59 }
0x1b62   :  { %v3489_v49 = vpop.permute.xlu1 %3488 }
0x1b63   :  { %v3493_v56 = vsel %vm979_vm11, %v3492_v46, %v3489_v49  ;;  %v4042_v46 = vld [vmem:[%s5538_s6 + $0x58] sm:$0xff]  ;;  %v4043_v49 = vld [vmem:[%s5538_s6 + $0x60] sm:$0xff] }
0x1b64   :  { %v3495_v33 = vrot.slane %v3493_v56, 3  ;;  %v4558_v56 = vpack.c.bf16 %v4044_v50, %v4043_v49 }
0x1b66   :  { %v2804_v54 = vpop.permute.xlu1 %2803 }
0x1b67   :  { %v2808_v57 = vsel %vm979_vm11, %v2807_v55, %v2804_v54  ;;  %v4046_v55 = vld [vmem:[%s5538_s6 + $0x78] sm:$0xff]  ;;  %v3637_v54 = vrot.slane %v5228_v28, %v1807_v42 }
0x1b68   :  { %v3497_v58 = vsel %vm159_vm2, %v2808_v57, %v3495_v33 }
0x1b69   :  { %4406 = vmatprep.mubr.msk.f32.mxu0 %vm164_vm4, %v3497_v58 }
0x1b6a   :  { %4407 = vmatmul.mubr.msk.f32.vlgmr.msra.gmra.mrb[24].mxu0 %vm164_vm4, %v3495_v33  ;;  %v4562_v33 = vpack.c.bf16 %v4046_v55, %v4045_v52 }
0x1b6b   :  { %4553 = vmatpush3.bf16.msra.mxu0 %v4550_v59 }
0x1c3d   :  { %v4408_v38 = vpop.f32.mrb[24].mxu0 }
0x1c3e   :  { %v3584_v62 = vadd.f32 %v4408_v38, %v5200_v2  ;;  %v3574_v63 = vpop.f32.mrb[25].mxu0 }
0x1c3f   :  { %v3583_v0 = vadd.f32 %v3574_v63, %v5202_v4 }
0x1c40   :  { %v3590_v1 = vadd.f32 %v3588_v36, %v3584_v62 }
0x1c41   :  { %v5435_v13 = vadd.f32 %v3588_v36, %v3583_v0 }
0x1c42   :  { %v3594_v35 = vsel %vm168_vm5, %v3590_v1, 0.0 }
0x1c43   :  { %3595 = vadd.xlane.f32.xlu1 %v3594_v35  ;;  %v3591_v53 = vsel %vm164_vm4, %v5435_v13, 0.0 }
0x1c44   :  { %3592 = vadd.xlane.f32.xlu0 %v3591_v53 }
0x1cd0   :  { %v3596_v20 = vpop.xlane.xlu1 %3595 }
0x1cd1   :  { %v3598_v5 = vmul.f32 0.03125, %v3596_v20  ;;  %v3593_v6 = vpop.xlane.xlu0 %3592 }
0x1cd2   :  { %v3597_v34 = vmul.f32 0.03125, %v3593_v6 }
0x1cd3   :  { %v3600_v47 = vsub.f32 %v3590_v1, %v3598_v5 }
0x1cd4   :  { %v3599_v2 = vsub.f32 %v5435_v13, %v3597_v34 }
0x1cd5   :  { %v3602_v7 = vmul.f32 %v3600_v47, %v3600_v47 }
0x1cd6   :  { %v3601_v48 = vmul.f32 %v3599_v2, %v3599_v2 }
0x1cd7   :  { %v3606_v9 = vsel %vm168_vm5, %v3602_v7, 0.0 }
0x1cd8   :  { %v3603_v4 = vsel %vm164_vm4, %v3601_v48, 0.0 }
0x1cd9   :  { %3604 = vadd.xlane.f32.xlu0 %v3603_v4 }
0x1cdd   :  { %3607 = vadd.xlane.f32.xlu0 %v3606_v9 }
0x1d66   :  { %v3605_v18 = vpop.xlane.xlu0 %3604 }
0x1d67   :  { %v3609_v51 = vmul.f32 0.03125, %v3605_v18  ;;  %v3854_v18 = vld [vmem:[%s5540_s8 + $0x18] sm:$0xff] }
0x1d69   :  { %v3611_v22 = vadd.f32 1e-06, %v3609_v51 }
0x1d6a   :  { %v3608_v23 = vpop.xlane.xlu0 %3607 }
0x1d6b   :  { %4670 = vrsqrt.f32 %v3611_v22  ;;  %v3610_v15 = vmul.f32 0.03125, %v3608_v23 }
0x1d6d   :  { %v3612_v24 = vadd.f32 1e-06, %v3610_v15 }
0x1d6f   :  { %4672 = vrsqrt.f32 %v3612_v24  ;;  %v4680_v24 = vld [vmem:[%s5541_s9] sm:$0xff] }
0x1d75   :  { %v4671_v26 = vpop.eup %4670 }
0x1d76   :  { %v3615_v27 = vmul.f32 %v4671_v26, %v3599_v2  ;;  %v3849_v26 = vrot.slane %v4680_v24, %v4917_v21 }
0x1d78   :  { %v3621_v30 = vmul.f32 %v3620_v25, %v3615_v27 }
0x1d79   :  { %v4673_v31 = vpop.eup %4672 }
0x1d7a   :  { %v3616_v61 = vmul.f32 %v4673_v31, %v3600_v47  ;;  %v3627_v37 = vadd.f32 %v3626_v29, %v3621_v30  ;;  %v3822_v47 = vrot.slane %v5228_v28, %v1993_v60  ;;  %v3852_v60 = vld [vmem:[%s5540_s8 + $0x8] sm:$0xff]  ;;  %v3858_v31 = vrot.slane %v4680_v24, %v5153_v8 }
0x1d7b   :  { %v4567_v28 = vpack.c.bf16 %v3852_v60, %v3851_v40 }
0x1d7c   :  { %v3622_v39 = vmul.f32 %v3620_v25, %v3616_v61  ;;  %4417 = vmatprep.mubr.msk.f32.mxu1 %vm164_vm4, %v3627_v37 }
0x1d7e   :  { %v3628_v43 = vadd.f32 %v3626_v29, %v3622_v39 }
0x1d80   :  { %4418 = vmatmul.mubr.msk.f32.vlgmr.msra.gmra.mrb[52].mxu1 %vm164_vm4, %v3628_v43 }
0x1d81   :  { %4447 = vmatprep.mubr.msk.f32.mxu1 %vm4707_vm6, %v4706_v32  ;;  %v4554_v32 = vpack.c.bf16 %v4042_v46, %v4041_v45  ;;  %4568 = vmatpush3.bf16.msra.mxu1 %v4567_v28 }
0x1d82   :  { %4569 = vmatprep.subr.bf16.mxu1 %v4705_v3  ;;  %v3844_v3 = vrot.slane %v4680_v24, %v4909_v19 }
0x1d83   :  { %4555 = vmatprep.subr.bf16.mxu0 %v4554_v32 }
0x1d84   :  { %4557 = vmatpush3.bf16.msra.mxu0 %v4554_v32 }
0x1d85   :  { %4559 = vmatprep.subr.bf16.mxu0 %v4558_v56 }
0x1d88   :  { %4561 = vmatpush3.bf16.msra.mxu0 %v4558_v56 }
0x1d89   :  { %4563 = vmatprep.subr.bf16.mxu0 %v4562_v33 }
0x1d8c   :  { %4565 = vmatpush3.bf16.msra.mxu0 %v4562_v33 }
0x1e53   :  { %v4419_v57 = vpop.f32.mrb[52].mxu1 }
0x1e54   :  { %v3716_v58 = vadd.f32 %v4419_v57, %v3637_v54  ;;  %v3710_v36 = vpop.f32.mrb[53].mxu1 }
0x1e55   :  { %v3711_v38 = vadd.f32 %v3710_v36, %v3637_v54 }
0x1e56   :  { %v3722_v62 = vmul.f32 0.70710677, %v3716_v58  ;;  %v3720_v5 = vmul.f32 0.5, %v3716_v58 }
0x1e57   :  { %v3721_v63 = vmul.f32 0.70710677, %v3711_v38  ;;  %v3719_v53 = vmul.f32 0.5, %v3711_v38 }
0x1e58   :  { %4674 = verf.f32 %v3722_v62 }
0x1e59   :  { %4676 = verf.f32 %v3721_v63 }
0x1e62   :  { %v4675_v0 = vpop.eup %4674 }
0x1e63   :  { %v4677_v1 = vpop.eup %4676  ;;  %v3726_v35 = vadd.f32 1.0, %v4675_v0 }
0x1e64   :  { %v3725_v20 = vadd.f32 1.0, %v4677_v1 }
0x1e65   :  { %v3728_v34 = vmul.f32 %v3726_v35, %v3720_v5 }
0x1e66   :  { %v3727_v6 = vmul.f32 %v3725_v20, %v3719_v53 }
0x1e68   :  { %4436 = vmatprep.mubr.msk.f32.mxu0 %vm67_vm0, %v3727_v6 }
0x1e69   :  { %4437 = vmatmul.mubr.msk.f32.vlgmr.msra.gmra.mrb[26].mxu0 %vm67_vm0, %v3728_v34 }
0x1f3c   :  { %v4438_v42 = vpop.f32.mrb[26].mxu0 }
0x1f3d   :  { %v3810_v2 = vpop.f32.mrb[27].mxu0 }
0x1f3e   :  { %v3818_v48 = vadd.f32 %v3810_v2, %v5435_v13  ;;  %v3853_v13 = vld [vmem:[%s5540_s8 + $0x10] sm:$0xff]  ;;  %s4722_s8 = smov [#allocation2]  }
0x1f3f   :  { %v4570_v51 = vpack.c.bf16 %v3854_v18, %v3853_v13  ;;  %s3939_s1 = sshll.u32 %s4722_s8, 4  ;;  %s3940_s1 = int_to_ptr.vmem [resolvable:$true] %s3939_s1 }
0x1f40   :  { %v3823_v4 = vadd.f32 %v3822_v47, %v3818_v48  ;;  %s4681_s9 = scalar_lea.vmem %s3940_s1, 32  ;;  %p4686_p1 = scmp.lt.s32.totalorder %s3940_s1, %s3940_s1 }
0x1f41   :  { %4571 = vmatpush3.bf16.msra.mxu1 %v4570_v51  ;;  %p4682_p0 = scmp.ne.s32.totalorder %s3940_s1, %s4681_s9  ;;  %p4687_p2 = scmp.lt.s32.totalorder %s4681_s9, %s4681_s9 }
0x1f42   :  { %v3825_v7 = vrot.slane %v3823_v4, 4 }
0x1f43   :  { %p4688_p3 = por %p4687_p2, %p4686_p1 }
0x1f44   :  { %v3827_v9 = vsel %vm157_vm1, %v3823_v4, %v3825_v7 }
0x1f45   :  { %v3828_v10 = vsel %vm168_vm5, %v3827_v9, 0.0  ;;  %p4689_p4 = pnand %p4688_p3, %p4682_p0 }
0x1f46   :  { %3829 = vadd.xlane.f32.xlu0 %v3828_v10 }
0x1fd3   :  { %v3830_v11 = vpop.xlane.xlu0 %3829 }
0x1fd4   :  { %v3831_v12 = vmul.f32 0.03125, %v3830_v11 }
0x1fd6   :  { %v3832_v14 = vsub.f32 %v3827_v9, %v3831_v12 }
0x1fd8   :  { %v3833_v16 = vmul.f32 %v3832_v14, %v3832_v14 }
0x1fda   :  { %v3834_v17 = vsel %vm168_vm5, %v3833_v16, 0.0 }
0x1fdb   :  { %3835 = vadd.xlane.f32.xlu1 %v3834_v17 }
0x2068   :  { %v3836_v22 = vpop.xlane.xlu1 %3835 }
0x2069   :  { %v3837_v23 = vmul.f32 0.03125, %v3836_v22 }
0x206b   :  { %v3838_v15 = vadd.f32 1e-06, %v3837_v23 }
0x206d   :  { %4678 = vrsqrt.f32 %v3838_v15 }
0x2077   :  { %v4679_v25 = vpop.eup %4678 }
0x2078   :  { %v3840_v27 = vmul.f32 %v4679_v25, %v3832_v14 }
0x207a   :  { %v3845_v29 = vmul.f32 %v3844_v3, %v3840_v27 }
0x207c   :  { %v3850_v30 = vadd.f32 %v3849_v26, %v3845_v29 }
0x207e   :  { %4448 = vmatmul.mubr.msk.f32.vlgmr.msra.gmra.mrb[54].mxu1 %vm164_vm4, %v3850_v30 }
0x2151   :  { %v3928_v61 = vpop.f32.mrb[54].mxu1 }
0x2152   :  { %v3929_v37 = vadd.f32 %v3928_v61, %v3858_v31  ;;  %v4449_v39 = vpop.f32.mrb[55].mxu1 }
0x2154   :  { %3932 = vst [vmem:[#allocation2] sm:$0x3] %v3929_v37 }
0x2155   :  { %4692 = shalt.err (!%p4689_p4)
}
0x2156   :  { %s4693_s14 = scalar_lea.hbm %s5542_s10, 32 }
0x2157   :  { %p4694_p5 = scmp.ne.s32.totalorder %s5542_s10, %s4693_s14  ;;  %p4697_p6 = scmp.lt.u32.totalorder %s4693_s14, %s5542_s10 }
0x2159   :  { %p4699_p7 = pnand %p4697_p6, %p4694_p5 }
0x215b   :  { %4702 = shalt.err (!%p4699_p7)
}
0x215c   :  { %3942 = dma.vmem_to_hbm [thread:$0]  %s3940_s1, 32, %s5542_s10, [#allocation3]  }
0x215d   :  { %4703 = dma.done.wait [#allocation3], 32  }
0x215e   :  { %4704 = vsyncadd [#allocation3], 4294967264 }
0x215f   :  { %3946 = vsyncpa [#allocation3], 1 }

</bundles_post_ra>
